<compile_context>
chip_gen: v7x
topology: tpu7x:2x2x1
jax: 0.10.0
libtpu: 0.0.40
codegen_flags: <defaults>
</compile_context>

<pallas_src>
import functools

import jax
import jax.numpy as jnp
import numpy as np
from jax.experimental import pallas as pl
from jax.experimental.pallas import tpu as pltpu

# ---- constants from the PyTorch module -------------------------------------
ELEM_LIST_LEN = 23
ATOM_FDIM = ELEM_LIST_LEN + 6 + 5 + 4 + 1     # 39
BOND_FDIM = 5 + 6                             # 11
MAX_NB = 6
LANE = 128


def _round_up(x, m):
    return ((x + m - 1) // m) * m


# ---- Pallas kernel (one grid step == one molecule) ---------------------------
def mpn_mol_kernel(natoms_ref, fa_ref, fb_ref, adja_ref, adjb_ref,
                   wi_ref, wh_ref, woa_ref, woh_ref, bo_ref, out_ref, *, depth):
    """Per-molecule MPN forward, everything VMEM resident.

    natoms: (n_mol,)         i32  SMEM (scalar prefetch) - valid atoms per mol
    fa:     (Am, AF_pad)     f32  atom features (zero-padded rows/cols)
    fb:     (Bm, F_pad)      f32  bond features (zero-padded rows/cols)
    adja:   (Am, Bm)         bf16 atom<-bond incidence counts (exact)
    adjb:   (Bm, Bm)         bf16 bond<-bond incidence counts (exact)
    wi:     (F_pad, H_pad)   f32  W_i (stored in x out)
    wh:     (H_pad, H_pad)   f32  W_h
    woa:    (AF_pad, H_pad)  f32  atom-feature half of W_o
    woh:    (H_pad, H_pad)   f32  message half of W_o
    bo:     (1, H_pad)       f32  W_o bias
    out:    (Am, H_pad)      f32
    """
    # binput = W_i(fbonds); message = relu(binput)
    binput = jnp.dot(fb_ref[...], wi_ref[...], preferred_element_type=jnp.float32)
    message = jnp.maximum(binput, 0.0)

    # adjacency counts are small integers, exact in bf16; compute in f32
    adjb = adjb_ref[...].astype(jnp.float32)
    wh = wh_ref[...]

    # depth-1 rounds of message passing (depth is small and static -> unrolled).
    for _ in range(depth - 1):
        nei = jnp.dot(adjb, message, preferred_element_type=jnp.float32)
        nei = jnp.dot(nei, wh, preferred_element_type=jnp.float32)
        # TODO(synk): nn.Dropout is identity in eval mode; implemented as identity.
        message = jnp.maximum(binput + nei, 0.0)

    # Atom readout: gather-sum incoming bond messages, then W_o + relu.
    # W_o([fatoms, nei]) == fatoms @ W_o[:ATOM_FDIM] + nei @ W_o[ATOM_FDIM:] + b_o
    nei_a = jnp.dot(adja_ref[...].astype(jnp.float32), message,
                    preferred_element_type=jnp.float32)
    hidden = (jnp.dot(fa_ref[...], woa_ref[...], preferred_element_type=jnp.float32)
              + jnp.dot(nei_a, woh_ref[...], preferred_element_type=jnp.float32)
              + bo_ref[...])
    hidden = jnp.maximum(hidden, 0.0)

    # Zero out padded atom rows so the output matches F.pad(...) in the original.
    n_valid = natoms_ref[pl.program_id(0)]
    row = jax.lax.broadcasted_iota(jnp.int32, hidden.shape, 0)
    out_ref[...] = jnp.where(row < n_valid, hidden, 0.0)


# ---- host-side packing: batched graph -> per-molecule dense blocks ----------
def _pack_per_molecule(fatoms, fbonds, agraph, bgraph, scope):
    """Split the batched graph into per-molecule, lane-padded dense blocks.

    Bonds/atoms only connect within a molecule (see MPN.tensorize), so the
    global gather-sum is block-diagonal; only the per-molecule blocks are
    materialized.  Index 0 (the all-zero padding bond) is dropped entirely,
    which is exact because message[0] == 0 (fbonds[0] == 0, W_i has no bias).
    """
    fatoms = np.asarray(fatoms, np.float32)
    fbonds = np.asarray(fbonds, np.float32)
    agraph = np.asarray(agraph, np.int32)
    bgraph = np.asarray(bgraph, np.int32)
    n_atoms, af = fatoms.shape
    _, bfdim = fbonds.shape
    n_mol = len(scope)

    af_pad = _round_up(af, LANE)
    bf_pad = _round_up(bfdim, LANE)

    # bond -> molecule: every real bond appears in agraph of its destination atom.
    atom_mol = np.zeros(n_atoms, np.int32)
    for m, (st, le) in enumerate(scope):
        atom_mol[st:st + le] = m
    mol_bonds = [[] for _ in range(n_mol)]
    for a in range(n_atoms):
        for b in agraph[a]:
            if b > 0:
                mol_bonds[atom_mol[a]].append(int(b))
    mol_bonds = [sorted(set(bs)) for bs in mol_bonds]

    max_atoms = max(le for _, le in scope)
    max_bonds = max((len(bs) for bs in mol_bonds), default=1)
    am = max(_round_up(max_atoms, 16), 16)       # sublane-friendly (bf16 adj rows)
    bm = max(_round_up(max_bonds, LANE), LANE)   # lane-dense contraction dim

    fa_m = np.zeros((n_mol, am, af_pad), np.float32)
    fb_m = np.zeros((n_mol, bm, bf_pad), np.float32)
    adja = np.zeros((n_mol, am, bm), np.float32)
    adjb = np.zeros((n_mol, bm, bm), np.float32)
    natoms = np.zeros((n_mol,), np.int32)

    for m, (st, le) in enumerate(scope):
        gb = np.asarray(mol_bonds[m], np.int32)
        nb = gb.shape[0]
        natoms[m] = le
        fa_m[m, :le, :af] = fatoms[st:st + le]
        if nb:
            fb_m[m, :nb, :bfdim] = fbonds[gb]
            # adjb[p, q] = #{i : bgraph[gb[p], i] == gb[q]}   (gather-sum counts)
            adjb[m, :nb, :nb] = (bgraph[gb][:, :, None] == gb[None, None, :]).sum(1)
            # adja[r, q] = #{i : agraph[st + r, i] == gb[q]}
            adja[m, :le, :nb] = (agraph[st:st + le][:, :, None]
                                 == gb[None, None, :]).sum(1)

    return (jnp.asarray(fa_m), jnp.asarray(fb_m),
            jnp.asarray(adja, dtype=jnp.bfloat16),
            jnp.asarray(adjb, dtype=jnp.bfloat16),
            jnp.asarray(natoms), am, bm, af_pad, bf_pad)


# ---- wrapper ----------------------------------------------------------------
def mpn_forward(params, fatoms, fbonds, agraph, bgraph, scope, depth):
    hidden = params["W_i"].shape[1]
    h_pad = _round_up(hidden, LANE)

    (fa_m, fb_m, adja_m, adjb_m, natoms,
     am, bm, af_pad, bf_pad) = _pack_per_molecule(fatoms, fbonds, agraph,
                                                  bgraph, scope)

    def pad2(w, rows, cols):
        w = jnp.asarray(w, jnp.float32)
        return jnp.pad(w, ((0, rows - w.shape[0]), (0, cols - w.shape[1])))

    wi = pad2(params["W_i"], bf_pad, h_pad)
    wh = pad2(params["W_h"], h_pad, h_pad)
    woa = pad2(params["W_o_a"], af_pad, h_pad)
    woh = pad2(params["W_o_h"], h_pad, h_pad)
    bo = pad2(params["b_o"], 1, h_pad)

    n_mol = len(scope)
    grid_spec = pltpu.PrefetchScalarGridSpec(
        num_scalar_prefetch=1,
        grid=(n_mol,),
        in_specs=[
            pl.BlockSpec((None, am, af_pad), lambda m, nat: (m, 0, 0)),   # fa
            pl.BlockSpec((None, bm, bf_pad), lambda m, nat: (m, 0, 0)),   # fb
            pl.BlockSpec((None, am, bm),     lambda m, nat: (m, 0, 0)),   # adja
            pl.BlockSpec((None, bm, bm),     lambda m, nat: (m, 0, 0)),   # adjb
            pl.BlockSpec((bf_pad, h_pad),    lambda m, nat: (0, 0)),      # W_i
            pl.BlockSpec((h_pad, h_pad),     lambda m, nat: (0, 0)),      # W_h
            pl.BlockSpec((af_pad, h_pad),    lambda m, nat: (0, 0)),      # W_o_a
            pl.BlockSpec((h_pad, h_pad),     lambda m, nat: (0, 0)),      # W_o_h
            pl.BlockSpec((1, h_pad),         lambda m, nat: (0, 0)),      # b_o
        ],
        out_specs=pl.BlockSpec((None, am, h_pad), lambda m, nat: (m, 0, 0)),
    )

    out = pl.pallas_call(
        functools.partial(mpn_mol_kernel, depth=depth),
        grid_spec=grid_spec,
        out_shape=jax.ShapeDtypeStruct((n_mol, am, h_pad), jnp.float32),
        compiler_params=pltpu.CompilerParams(
            dimension_semantics=("parallel",),
            vmem_limit_bytes=32 * 1024 * 1024),
    )(natoms, fa_m, fb_m, adja_m, adjb_m, wi, wh, woa, woh, bo)

    max_len = max(le for _, le in scope)
    return out[:, :max_len, :hidden]


# ---- pure-JAX reference (mirrors the PyTorch forward exactly) ---------------
def mpn_reference(params, fatoms, fbonds, agraph, bgraph, scope, depth):
    binput = fbonds @ params["W_i"]
    message = jnp.maximum(binput, 0.0)
    for _ in range(depth - 1):
        nei = jnp.take(message, bgraph, axis=0).sum(axis=1)
        nei = nei @ params["W_h"]
        message = jnp.maximum(binput + nei, 0.0)
    nei = jnp.take(message, agraph, axis=0).sum(axis=1)
    ainput = jnp.concatenate([fatoms, nei], axis=1)
    w_o = jnp.concatenate([params["W_o_a"], params["W_o_h"]], axis=0)
    atom_hiddens = jnp.maximum(ainput @ w_o + params["b_o"], 0.0)
    max_len = max(le for _, le in scope)
    vecs = []
    for st, le in scope:
        cur = atom_hiddens[st:st + le]
        vecs.append(jnp.pad(cur, ((0, max_len - le), (0, 0))))
    return jnp.stack(vecs, axis=0)


# ---- synthetic tensorize (ring molecules; mimics MPN.tensorize, no RDKit) ---
def build_ring_batch(mol_sizes, atom_feat, bond_feat):
    atom_feat = np.asarray(atom_feat, np.float32)
    bond_feat = np.asarray(bond_feat, np.float32)
    n_atoms_total = atom_feat.shape[0]
    fbonds = [np.zeros(ATOM_FDIM + BOND_FDIM, np.float32)]   # padding bond 0
    in_bonds = [[] for _ in range(n_atoms_total)]
    all_bonds = [(-1, -1)]
    scope = []
    total_atoms = 0
    ub = 0
    for n in mol_sizes:
        for i in range(n):                  # ring: atom i bonded to atom (i+1) % n
            x = total_atoms + i
            y = total_atoms + (i + 1) % n
            bfeat = bond_feat[ub]; ub += 1
            b = len(all_bonds); all_bonds.append((x, y))
            fbonds.append(np.concatenate([atom_feat[x], bfeat]))
            in_bonds[y].append(b)
            b = len(all_bonds); all_bonds.append((y, x))
            fbonds.append(np.concatenate([atom_feat[y], bfeat]))
            in_bonds[x].append(b)
        scope.append((total_atoms, n))
        total_atoms += n
    total_bonds = len(all_bonds)
    agraph = np.zeros((total_atoms, MAX_NB), np.int32)
    bgraph = np.zeros((total_bonds, MAX_NB), np.int32)
    for a in range(total_atoms):
        for i, b in enumerate(in_bonds[a]):
            agraph[a, i] = b
    for b1 in range(1, total_bonds):
        x, y = all_bonds[b1]
        for i, b2 in enumerate(in_bonds[x]):
            if all_bonds[b2][0] != y:
                bgraph[b1, i] = b2
    return (jnp.asarray(atom_feat), jnp.asarray(np.stack(fbonds, 0)),
            jnp.asarray(agraph), jnp.asarray(bgraph), scope)


# ---- demo -------------------------------------------------------------------
if __name__ == "__main__":
    hidden_size = 32
    depth = 3
    mol_sizes = (5, 7)          # two ring molecules: 12 atoms, 24 directed bonds

    key = jax.random.PRNGKey(0)
    k = jax.random.split(key, 7)
    n_atoms = sum(mol_sizes)
    n_ubonds = sum(mol_sizes)   # one undirected bond per ring edge

    atom_feat = jax.random.uniform(k[0], (n_atoms, ATOM_FDIM), jnp.float32)
    bond_feat = jax.random.uniform(k[1], (n_ubonds, BOND_FDIM), jnp.float32)
    fatoms, fbonds, agraph, bgraph, scope = build_ring_batch(
        mol_sizes, atom_feat, bond_feat)

    # Deterministic parameters (stored transposed: [in_features, out_features]).
    scale = 0.1
    params = {
        "W_i": scale * jax.random.normal(
            k[2], (ATOM_FDIM + BOND_FDIM, hidden_size), jnp.float32),
        "W_h": scale * jax.random.normal(
            k[3], (hidden_size, hidden_size), jnp.float32),
        "W_o_a": scale * jax.random.normal(
            k[4], (ATOM_FDIM, hidden_size), jnp.float32),
        "W_o_h": scale * jax.random.normal(
            k[5], (hidden_size, hidden_size), jnp.float32),
        "b_o": scale * jax.random.normal(k[6], (1, hidden_size), jnp.float32),
    }

    mol_vecs = mpn_forward(params, fatoms, fbonds, agraph, bgraph, scope, depth)
    mol_vecs = jax.block_until_ready(mol_vecs)

    ref = mpn_reference(params, fatoms, fbonds, agraph, bgraph, scope, depth)
    np.testing.assert_allclose(np.asarray(mol_vecs), np.asarray(ref),
                               rtol=5e-4, atol=5e-4)

    assert mol_vecs.shape == (len(scope), max(le for _, le in scope), hidden_size)
    print("KERNEL_OK")
</pallas_src>

<mosaic_0001>
module attributes {stable_mosaic.version = 11 : i64} {
  func.func @mpn_mol_kernel(%arg0: i32, %arg1: memref<2xi32, #tpu.memory_space<smem>>, %arg2: memref<1x16x128xf32, #tpu.memory_space<vmem>>, %arg3: memref<1x128x128xf32, #tpu.memory_space<vmem>>, %arg4: memref<1x16x128xbf16, #tpu.memory_space<vmem>>, %arg5: memref<1x128x128xbf16, #tpu.memory_space<vmem>>, %arg6: memref<128x128xf32, #tpu.memory_space<vmem>>, %arg7: memref<128x128xf32, #tpu.memory_space<vmem>>, %arg8: memref<128x128xf32, #tpu.memory_space<vmem>>, %arg9: memref<128x128xf32, #tpu.memory_space<vmem>>, %arg10: memref<1x128xf32, #tpu.memory_space<vmem>>, %arg11: memref<1x16x128xf32, #tpu.memory_space<vmem>>) attributes {dimension_semantics = [#tpu.dimension_semantics<parallel>], iteration_bounds = array<i64: 2>, scalar_prefetch = 1 : i64, scratch_operands = 0 : i64, tpu.core_type = #tpu.core_type<tc>, window_params = [{transform_indices = @transform_0, window_bounds = array<i64: 1, 16, 128>}, {transform_indices = @transform_1, window_bounds = array<i64: 1, 128, 128>}, {transform_indices = @transform_2, window_bounds = array<i64: 1, 16, 128>}, {transform_indices = @transform_3, window_bounds = array<i64: 1, 128, 128>}, {pipeline_mode = #tpu.pipeline_mode<synchronous>, transform_indices = @transform_4, window_bounds = array<i64: 128, 128>}, {pipeline_mode = #tpu.pipeline_mode<synchronous>, transform_indices = @transform_5, window_bounds = array<i64: 128, 128>}, {pipeline_mode = #tpu.pipeline_mode<synchronous>, transform_indices = @transform_6, window_bounds = array<i64: 128, 128>}, {pipeline_mode = #tpu.pipeline_mode<synchronous>, transform_indices = @transform_7, window_bounds = array<i64: 128, 128>}, {pipeline_mode = #tpu.pipeline_mode<synchronous>, transform_indices = @transform_8, window_bounds = array<i64: 1, 128>}, {transform_indices = @transform_9, window_bounds = array<i64: 1, 16, 128>}]} {
    %c0 = arith.constant 0 : index
    %c0_0 = arith.constant 0 : index
    %c0_1 = arith.constant 0 : index
    %0 = vector.load %arg3[%c0, %c0_0, %c0_1] : memref<1x128x128xf32, #tpu.memory_space<vmem>>, vector<1x128x128xf32>
    %1 = vector.shape_cast %0 : vector<1x128x128xf32> to vector<128x128xf32>
    %c0_2 = arith.constant 0 : index
    %c0_3 = arith.constant 0 : index
    %2 = vector.load %arg6[%c0_2, %c0_3] : memref<128x128xf32, #tpu.memory_space<vmem>>, vector<128x128xf32>
    %cst = arith.constant dense<0.000000e+00> : vector<128x128xf32>
    %3 = tpu.matmul %1, %2, %cst {dimension_numbers = #tpu.dot_dimension_numbers<[1], [0], [0], [1], [0, 0, 1, 1], [], []>} : vector<128x128xf32>, vector<128x128xf32>, vector<128x128xf32> -> vector<128x128xf32>
    %cst_4 = arith.constant 0.000000e+00 : f32
    %4 = vector.broadcast %cst_4 : f32 to vector<128x128xf32>
    %5 = arith.maximumf %3, %4 : vector<128x128xf32>
    %c0_5 = arith.constant 0 : index
    %c0_6 = arith.constant 0 : index
    %c0_7 = arith.constant 0 : index
    %6 = vector.load %arg5[%c0_5, %c0_6, %c0_7] : memref<1x128x128xbf16, #tpu.memory_space<vmem>>, vector<1x128x128xbf16>
    %7 = vector.shape_cast %6 : vector<1x128x128xbf16> to vector<128x128xbf16>
    %8 = arith.extf %7 : vector<128x128xbf16> to vector<128x128xf32>
    %c0_8 = arith.constant 0 : index
    %c0_9 = arith.constant 0 : index
    %9 = vector.load %arg7[%c0_8, %c0_9] : memref<128x128xf32, #tpu.memory_space<vmem>>, vector<128x128xf32>
    %cst_10 = arith.constant dense<0.000000e+00> : vector<128x128xf32>
    %10 = tpu.matmul %8, %5, %cst_10 {dimension_numbers = #tpu.dot_dimension_numbers<[1], [0], [0], [1], [0, 0, 1, 1], [], []>} : vector<128x128xf32>, vector<128x128xf32>, vector<128x128xf32> -> vector<128x128xf32>
    %cst_11 = arith.constant dense<0.000000e+00> : vector<128x128xf32>
    %11 = tpu.matmul %10, %9, %cst_11 {dimension_numbers = #tpu.dot_dimension_numbers<[1], [0], [0], [1], [0, 0, 1, 1], [], []>} : vector<128x128xf32>, vector<128x128xf32>, vector<128x128xf32> -> vector<128x128xf32>
    %12 = arith.addf %3, %11 : vector<128x128xf32>
    %cst_12 = arith.constant 0.000000e+00 : f32
    %13 = vector.broadcast %cst_12 : f32 to vector<128x128xf32>
    %14 = arith.maximumf %12, %13 : vector<128x128xf32>
    %cst_13 = arith.constant dense<0.000000e+00> : vector<128x128xf32>
    %15 = tpu.matmul %8, %14, %cst_13 {dimension_numbers = #tpu.dot_dimension_numbers<[1], [0], [0], [1], [0, 0, 1, 1], [], []>} : vector<128x128xf32>, vector<128x128xf32>, vector<128x128xf32> -> vector<128x128xf32>
    %cst_14 = arith.constant dense<0.000000e+00> : vector<128x128xf32>
    %16 = tpu.matmul %15, %9, %cst_14 {dimension_numbers = #tpu.dot_dimension_numbers<[1], [0], [0], [1], [0, 0, 1, 1], [], []>} : vector<128x128xf32>, vector<128x128xf32>, vector<128x128xf32> -> vector<128x128xf32>
    %17 = arith.addf %3, %16 : vector<128x128xf32>
    %cst_15 = arith.constant 0.000000e+00 : f32
    %18 = vector.broadcast %cst_15 : f32 to vector<128x128xf32>
    %19 = arith.maximumf %17, %18 : vector<128x128xf32>
    %c0_16 = arith.constant 0 : index
    %c0_17 = arith.constant 0 : index
    %c0_18 = arith.constant 0 : index
    %20 = vector.load %arg4[%c0_16, %c0_17, %c0_18] : memref<1x16x128xbf16, #tpu.memory_space<vmem>>, vector<1x16x128xbf16>
    %21 = vector.shape_cast %20 : vector<1x16x128xbf16> to vector<16x128xbf16>
    %22 = arith.extf %21 : vector<16x128xbf16> to vector<16x128xf32>
    %cst_19 = arith.constant dense<0.000000e+00> : vector<16x128xf32>
    %23 = tpu.matmul %22, %19, %cst_19 {dimension_numbers = #tpu.dot_dimension_numbers<[1], [0], [0], [1], [0, 0, 1, 1], [], []>} : vector<16x128xf32>, vector<128x128xf32>, vector<16x128xf32> -> vector<16x128xf32>
    %c0_20 = arith.constant 0 : index
    %c0_21 = arith.constant 0 : index
    %c0_22 = arith.constant 0 : index
    %24 = vector.load %arg2[%c0_20, %c0_21, %c0_22] : memref<1x16x128xf32, #tpu.memory_space<vmem>>, vector<1x16x128xf32>
    %25 = vector.shape_cast %24 : vector<1x16x128xf32> to vector<16x128xf32>
    %c0_23 = arith.constant 0 : index
    %c0_24 = arith.constant 0 : index
    %26 = vector.load %arg8[%c0_23, %c0_24] : memref<128x128xf32, #tpu.memory_space<vmem>>, vector<128x128xf32>
    %cst_25 = arith.constant dense<0.000000e+00> : vector<16x128xf32>
    %27 = tpu.matmul %25, %26, %cst_25 {dimension_numbers = #tpu.dot_dimension_numbers<[1], [0], [0], [1], [0, 0, 1, 1], [], []>} : vector<16x128xf32>, vector<128x128xf32>, vector<16x128xf32> -> vector<16x128xf32>
    %c0_26 = arith.constant 0 : index
    %c0_27 = arith.constant 0 : index
    %28 = vector.load %arg9[%c0_26, %c0_27] : memref<128x128xf32, #tpu.memory_space<vmem>>, vector<128x128xf32>
    %cst_28 = arith.constant dense<0.000000e+00> : vector<16x128xf32>
    %29 = tpu.matmul %23, %28, %cst_28 {dimension_numbers = #tpu.dot_dimension_numbers<[1], [0], [0], [1], [0, 0, 1, 1], [], []>} : vector<16x128xf32>, vector<128x128xf32>, vector<16x128xf32> -> vector<16x128xf32>
    %30 = arith.addf %27, %29 : vector<16x128xf32>
    %c0_29 = arith.constant 0 : index
    %c0_30 = arith.constant 0 : index
    %31 = vector.load %arg10[%c0_29, %c0_30] : memref<1x128xf32, #tpu.memory_space<vmem>>, vector<1x128xf32>
    %32 = vector.broadcast %31 : vector<1x128xf32> to vector<16x128xf32>
    %33 = arith.addf %30, %32 : vector<16x128xf32>
    %cst_31 = arith.constant 0.000000e+00 : f32
    %34 = vector.broadcast %cst_31 : f32 to vector<16x128xf32>
    %35 = arith.maximumf %33, %34 : vector<16x128xf32>
    %36 = arith.index_cast %arg0 : i32 to index
    %37 = memref.load %arg1[%36] : memref<2xi32, #tpu.memory_space<smem>>
    %38 = tpu.iota {dimensions = array<i32: 0>} : vector<16x128xi32>
    %39 = vector.broadcast %37 : i32 to vector<16x128xi32>
    %40 = arith.cmpi slt, %38, %39 : vector<16x128xi32>
    %cst_32 = arith.constant 0.000000e+00 : f32
    %41 = vector.broadcast %cst_32 : f32 to vector<16x128xf32>
    %42 = arith.select %40, %35, %41 : vector<16x128xi1>, vector<16x128xf32>
    %c0_33 = arith.constant 0 : index
    %c0_34 = arith.constant 0 : index
    %c0_35 = arith.constant 0 : index
    %43 = vector.load %arg11[%c0_33, %c0_34, %c0_35] : memref<1x16x128xf32, #tpu.memory_space<vmem>>, vector<1x16x128xf32>
    %44 = vector.shape_cast %43 : vector<1x16x128xf32> to vector<16x128xf32>
    %45 = vector.shape_cast %42 : vector<16x128xf32> to vector<1x16x128xf32>
    tpu.vector_store %arg11[%c0_33, %c0_34, %c0_35], %45 {strides = array<i32>} : memref<1x16x128xf32, #tpu.memory_space<vmem>>, vector<1x16x128xf32>,
    return
  }
  func.func @transform_0(%arg0: i32, %arg1: memref<2xi32, #tpu.memory_space<smem>>) -> (i32, i32, i32) {
    %c0_i32 = arith.constant 0 : i32
    %c0_i32_0 = arith.constant 0 : i32
    %c0_i32_1 = arith.constant 0 : i32
    return %arg0, %c0_i32, %c0_i32_0 : i32, i32, i32
  }
  func.func @transform_1(%arg0: i32, %arg1: memref<2xi32, #tpu.memory_space<smem>>) -> (i32, i32, i32) {
    %c0_i32 = arith.constant 0 : i32
    %c0_i32_0 = arith.constant 0 : i32
    %c0_i32_1 = arith.constant 0 : i32
    return %arg0, %c0_i32, %c0_i32_0 : i32, i32, i32
  }
  func.func @transform_2(%arg0: i32, %arg1: memref<2xi32, #tpu.memory_space<smem>>) -> (i32, i32, i32) {
    %c0_i32 = arith.constant 0 : i32
    %c0_i32_0 = arith.constant 0 : i32
    %c0_i32_1 = arith.constant 0 : i32
    return %arg0, %c0_i32, %c0_i32_0 : i32, i32, i32
  }
  func.func @transform_3(%arg0: i32, %arg1: memref<2xi32, #tpu.memory_space<smem>>) -> (i32, i32, i32) {
    %c0_i32 = arith.constant 0 : i32
    %c0_i32_0 = arith.constant 0 : i32
    %c0_i32_1 = arith.constant 0 : i32
    return %arg0, %c0_i32, %c0_i32_0 : i32, i32, i32
  }
  func.func @transform_4(%arg0: i32, %arg1: memref<2xi32, #tpu.memory_space<smem>>) -> (i32, i32) {
    %c0_i32 = arith.constant 0 : i32
    %c0_i32_0 = arith.constant 0 : i32
    %c0_i32_1 = arith.constant 0 : i32
    return %c0_i32, %c0_i32_0 : i32, i32
  }
  func.func @transform_5(%arg0: i32, %arg1: memref<2xi32, #tpu.memory_space<smem>>) -> (i32, i32) {
    %c0_i32 = arith.constant 0 : i32
    %c0_i32_0 = arith.constant 0 : i32
    %c0_i32_1 = arith.constant 0 : i32
    return %c0_i32, %c0_i32_0 : i32, i32
  }
  func.func @transform_6(%arg0: i32, %arg1: memref<2xi32, #tpu.memory_space<smem>>) -> (i32, i32) {
    %c0_i32 = arith.constant 0 : i32
    %c0_i32_0 = arith.constant 0 : i32
    %c0_i32_1 = arith.constant 0 : i32
    return %c0_i32, %c0_i32_0 : i32, i32
  }
  func.func @transform_7(%arg0: i32, %arg1: memref<2xi32, #tpu.memory_space<smem>>) -> (i32, i32) {
    %c0_i32 = arith.constant 0 : i32
    %c0_i32_0 = arith.constant 0 : i32
    %c0_i32_1 = arith.constant 0 : i32
    return %c0_i32, %c0_i32_0 : i32, i32
  }
  func.func @transform_8(%arg0: i32, %arg1: memref<2xi32, #tpu.memory_space<smem>>) -> (i32, i32) {
    %c0_i32 = arith.constant 0 : i32
    %c0_i32_0 = arith.constant 0 : i32
    %c0_i32_1 = arith.constant 0 : i32
    return %c0_i32, %c0_i32_0 : i32, i32
  }
  func.func @transform_9(%arg0: i32, %arg1: memref<2xi32, #tpu.memory_space<smem>>) -> (i32, i32, i32) {
    %c0_i32 = arith.constant 0 : i32
    %c0_i32_0 = arith.constant 0 : i32
    %c0_i32_1 = arith.constant 0 : i32
    return %arg0, %c0_i32, %c0_i32_0 : i32, i32, i32
  }
}

</mosaic_0001>

<bundles_post_ra>
// kernel: tpu_custom_call.1
= control target key start
LH: loop header
LB: loop body
LE: loop exit
PB: predicated region body
PF: predicated region fallthrough
CT: control target
= control target key end

     0   :  { %s4050_s0 = inlined_call_operand.hbm [shape: s32[2], index: 0, kind: input, shape index: {}]   ;;  %s4051_s1 = inlined_call_operand.hbm [shape: f32[2,16,128], index: 1, kind: input, shape index: {}]   ;;  %s4052_s2 = inlined_call_operand.hbm [shape: f32[2,128,128], index: 2, kind: input, shape index: {}]   ;;  %s4053_s3 = inlined_call_operand.hbm [shape: bf16[2,16,128], index: 3, kind: input, shape index: {}]   ;;  %s4054_s4 = inlined_call_operand.hbm [shape: bf16[2,128,128], index: 4, kind: input, shape index: {}]   ;;  %s4055_s5 = inlined_call_operand.hbm [shape: f32[128,128], index: 5, kind: input, shape index: {}]   ;;  %s4056_s6 = inlined_call_operand.hbm [shape: f32[128,128], index: 6, kind: input, shape index: {}]   ;;  %s4057_s7 = inlined_call_operand.hbm [shape: f32[128,128], index: 7, kind: input, shape index: {}]   ;;  %s4058_s8 = inlined_call_operand.hbm [shape: f32[128,128], index: 8, kind: input, shape index: {}]   ;;  %s4059_s9 = inlined_call_operand.vmem [shape: f32[1,128], index: 9, kind: input, shape index: {}]   ;;  %s4060_s10 = inlined_call_operand.hbm [shape: f32[2,16,128], index: 10, kind: output, shape index: {}]  }
   0x1   :  { %4086 = sst [smem:[#allocation33_spill]] %s4052_s2  ;;  %s2941_s15 = scalar_lea.hbm %s4050_s0, 16 }
   0x2   :  { %4087 = sst [smem:[#allocation34_spill]] %s4055_s5  ;;  %p2942_p0 = scmp.ne.s32.totalorder %s4050_s0, %s2941_s15 }
   0x3   :  { %4088 = sst [smem:[#allocation35_spill]] %s4056_s6  ;;  %p2945_p1 = scmp.lt.u32.totalorder %s2941_s15, %s4050_s0 }
   0x4   :  { %4089 = sst [smem:[#allocation36_spill]] %s4059_s9 }
   0x5   :  { %4090 = sst [smem:[#allocation37_spill]] %s4060_s10  ;;  %p2947_p2 = pnand %p2945_p1, %p2942_p0 }
   0x7   :  { %2950 = shalt.err (!%p2947_p2)  }
   0x8   :  { %s3273_s20 = smov [#allocation3]  }
   0x9   :  { %16 = dma.hbm_to_smem %s4050_s0, 16, %s3273_s20, [#allocation2] }
   0xa   :  { %3227 = dma.done.wait [#allocation2], 16 }
   0xb   :  { %3228 = vsyncadd [#allocation2], 4294967280 }
   0xc   :  { %18 = sfence }
   0xd   :  { %19 = vsyncpa [#allocation5], 0 }
   0xe   :  { %21 = vsyncpa [#allocation5 + $0x1], 0 }
   0xf   :  { %22 = vsyncpa [#allocation8], 0 }
  0x10   :  { %24 = vsyncpa [#allocation8 + $0x1], 0 }
  0x11   :  { %25 = vsyncpa [#allocation11], 0 }
  0x12   :  { %27 = vsyncpa [#allocation11 + $0x1], 0 }
  0x13   :  { %28 = vsyncpa [#allocation14], 0 }
  0x14   :  { %29 = vsyncpa [#allocation17], 0 }
  0x15   :  { %30 = vsyncpa [#allocation6], 0 }
  0x16   :  { %32 = vsyncpa [#allocation6 + $0x1], 0  ;;  %s3356_s23 = smov 0   ;;  %s3358_s24 = smov 0  }
  0x17   :  { %s3360_s25 = smov 0   ;;  %s3362_s0 = smov 0  }
  0x18 LB: > { %4091 = sst [smem:[#allocation27_spill]] %s3259_s23  ;;  %s3377_s26 = sadd.s32 4294967295, %s3271_s0   ;;  %s3271_s0 = sphi %s3362_s0, %s4132_s0   ;;  %s3267_s25 = sphi %s3360_s25, %s4134_s25   ;;  %s3263_s24 = sphi %s3358_s24, %s4136_s24   ;;  %s3259_s23 = sphi %s3356_s23, %s4135_s23  }
  0x19   : > { %4092 = sst [smem:[#allocation28_spill]] %s3267_s25  ;;  %s1892_s27 = sadd.s32 4294967294, %s3271_s0  }
  0x1a   : > { %p58_p3 = scmp.ne.s32.totalorder %s3263_s24, %s3259_s23  ;;  %p4061_p4 = scmp.eq.s32.totalorder %s3377_s26, 0 }
  0x1b   : > { %p271_p6 = scmp.eq.s32.totalorder %s1892_s27, 1  ;;  %p1893_p8 = scmp.ge.s32.totalorder %s3271_s0, 1 }
  0x1c   : > { %p3386_p7 = por %p4061_p4, %p58_p3  ;;  %p278_p10 = scmp.lt.s32.totalorder %s3271_s0, 3 }
  0x1d   : > { %p3391_p9 = por %p271_p6, %p58_p3  ;;  %s3274_s11 = smov [#allocation12]  }
  0x1e   : > { %s4093_s28 = scalar_select %p3386_p7, 1, 0 }
  0x1f   : > { %s4094_s29 = scalar_select %p3391_p9, 1, 0 }
  0x20   : > { %p3396_p11 = pnand %p1893_p8, %p278_p10  ;;  %s290_s12 = sshll.u32 %s3274_s11, 4  ;;  %s3400_s12 = int_to_ptr.vmem [resolvable:$true] %s290_s12 }
  0x21   : > { %4095 = sst [smem:[#allocation29_spill]] %s4094_s29  ;;  %s3275_s14 = smov [#allocation13]  }
  0x22   : > { %s4096_s30 = scalar_select %p3396_p11, 1, 0 }
  0x23   : > { %p2858_p12 = pneg %p3396_p11  ;;  %s303_s15 = sshll.u32 %s3275_s14, 4  ;;  %s3411_s15 = int_to_ptr.vmem [resolvable:$true] %s303_s15 }
  0x24   : > { %s4098_s5 = sld [smem:[#allocation34_spill]] }
  0x25   : > { %p3407_p0 = pnand %p2858_p12, %p4061_p4 }
  0x27   : > { %s4097_s13 = scalar_select %p3407_p0, 1, 0 }
  0x28   : > { %p3421_p2 = pneg %p3407_p0 }
  0x2a   : > { %s2951_s18 = scalar_lea.hbm %s4098_s5, 2048 }
  0x2b   : > { %p2952_p1 = scmp.ne.s32.totalorder %s4098_s5, %s2951_s18  ;;  %p2958_p8 = scmp.lt.u32.totalorder %s2951_s18, %s4098_s5 }
  0x2c   : > { %s4099_s21 = scalar_select %p3421_p2, 1, 0 }
  0x2d   : > { %p2954_p3 = pnand %p3421_p2, %p2952_p1 }
  0x2f   : > { %p2955_p6 = pneg %p2954_p3 }
  0x31   : > { %p2960_p10 = pnand %p2958_p8, %p2955_p6 }
  0x33   : > { %2963 = shalt.err (!%p2960_p10)
}
  0x34   : > { %s2964_s11 = scalar_lea.vmem %s3400_s12, 2048  ;;  %p2972_p5 = scmp.lt.s32.totalorder %s3400_s12, %s3400_s12 }
  0x35   : > { %p2965_p12 = scmp.ne.s32.totalorder %s3400_s12, %s2964_s11  ;;  %p2973_p9 = scmp.lt.s32.totalorder %s2964_s11, %s2964_s11 }
  0x37   : > { %p2967_p13 = pnand %p2965_p12, %p3421_p2  ;;  %p2974_p1 = por %p2973_p9, %p2972_p5 }
  0x39   : > { %p2968_p4 = pneg %p2967_p13 }
  0x3b   : > { %p2975_p3 = pnand %p2974_p1, %p2968_p4 }
  0x3d   : > { %2978 = shalt.err (!%p2975_p3)
}
  0x3e   : > { %s4064_s14 = smov 128   ;;  %s4066_s16 = smov 8  }
  0x3f   : > { %2861 = dma.hbm_to_vmem [thread:$0]  (!%p3407_p0), %s4098_s5, 2048, %s3400_s12, [#allocation11], %s4064_s14, %s4064_s14, %s4066_s16  }
  0x40   : > { %s4100_s6 = sld [smem:[#allocation35_spill]] }
  0x46   : > { %s2979_s22 = scalar_lea.hbm %s4100_s6, 2048 }
  0x47   : > { %p2980_p4 = scmp.ne.s32.totalorder %s4100_s6, %s2979_s22  ;;  %p2986_p13 = scmp.lt.u32.totalorder %s2979_s22, %s4100_s6 }
  0x49   : > { %p2982_p5 = pnand %p2980_p4, %p3421_p2 }
  0x4b   : > { %p2983_p9 = pneg %p2982_p5 }
  0x4d   : > { %p2988_p6 = pnand %p2986_p13, %p2983_p9 }
  0x4f   : > { %2991 = shalt.err (!%p2988_p6)
}
  0x50   : > { %s2992_s12 = scalar_lea.vmem %s3411_s15, 2048  ;;  %p3000_p1 = scmp.lt.s32.totalorder %s3411_s15, %s3411_s15 }
  0x51   : > { %p2993_p8 = scmp.ne.s32.totalorder %s3411_s15, %s2992_s12  ;;  %p3001_p3 = scmp.lt.s32.totalorder %s2992_s12, %s2992_s12 }
  0x53   : > { %p2995_p10 = pnand %p2993_p8, %p3421_p2  ;;  %p3002_p4 = por %p3001_p3, %p3000_p1 }
  0x55   : > { %p2996_p12 = pneg %p2995_p10 }
  0x57   : > { %p3003_p5 = pnand %p3002_p4, %p2996_p12 }
  0x59   : > { %3006 = shalt.err (!%p3003_p5)
}
  0x5a   : > { %2864 = dma.hbm_to_vmem [thread:$0]  (!%p3407_p0), %s4100_s6, 2048, %s3411_s15, [#allocation14], %s4064_s14, %s4064_s14, %s4066_s16  }
  0x5b   : > { %s3472_s17 = sadd.s32 1, %s3271_s0   ;;  %s45_s18 = sadd.s32 1, %s3267_s25 }
  0x5c   : > { %4101 = sst [smem:[#allocation30_spill]] %s3472_s17  ;;  %s42_s19 = ssub.s32 %s3271_s0, %s3472_s17 }
  0x5d   : > { %p52_p9 = scmp.ne.s32.totalorder %s3267_s25, %s3263_s24  ;;  %p43_p13 = scmp.eq.s32.totalorder %s42_s19, 0 }
  0x5e   : > { %p53_p6 = scmp.eq.s32.totalorder %s3271_s0, 0  ;;  %p4102_p8 = scmp.eq.s32.totalorder %s3377_s26, 1 }
  0x5f   : > { %p2892_p12 = scmp.lt.s32.totalorder %s3271_s0, 2  ;;  %s3491_s27 = sand.u32 1, %s3267_s25  }
  0x60   : > { %p3482_p10 = por %p4102_p8, %p52_p9  ;;  %p54_p1 = por %p53_p6, %p52_p9 }
  0x61   : > { %s3488_s22 = scalar_select %p43_p13, %s3267_s25, %s45_s18  }
  0x62   : > { %s4103_s20 = scalar_select %p3482_p10, 1, 0 }
  0x63   : > { %4105 = sst [smem:[#allocation32_spill]] %s3488_s22  ;;  %s4070_s15 = sand.u32 1, %s3271_s0  }
  0x64   : > { %4104 = sst [smem:[#allocation31_spill]] %s4103_s20  ;;  %s1902_s11 = sshll.u32 %s3491_s27, 7 }
  0x65   : > { %p3495_p3 = pnand %p2892_p12, %p54_p1  ;;  %s1928_s23 = sshll.u32 %s3271_s0, 11 }
  0x66   : > { %s4107_s2 = sld [smem:[#allocation33_spill]]  ;;  %s371_s18 = scalar_lea.vmem [#allocation7], %s1902_s11 }
  0x67   : > { %s4106_s12 = scalar_select %p3495_p3, 1, 0 }
  0x68   : > { %s378_s16 = sshll.u32 %s371_s18, 4  ;;  %s3509_s5 = scalar_lea.sflag [#allocation8], %s4070_s15  ;;  %s3505_s16 = int_to_ptr.vmem [resolvable:$true] %s378_s16 }
  0x69   : > { %p3515_p5 = pneg %p3495_p3 }
  0x6b   : > { %s4108_s22 = scalar_select %p3515_p5, 1, 0 }
  0x6c   : > { %s3503_s14 = scalar_lea.hbm %s4107_s2, %s1928_s23  ;;  %s3012_s11 = scalar_lea.hbm %s4107_s2, 4096 }
  0x6d   : > { %s3007_s6 = scalar_lea.hbm %s3503_s14, 2048  ;;  %p3013_p6 = scmp.lt.u32.totalorder %s3503_s14, %s4107_s2 }
  0x6e   : > { %p3008_p4 = scmp.ne.s32.totalorder %s3503_s14, %s3007_s6  ;;  %p3014_p8 = scmp.lt.u32.totalorder %s3012_s11, %s3007_s6 }
  0x6f   : > { %p3016_p1 = scmp.lt.u32.totalorder %s3007_s6, %s3503_s14 }
  0x70   : > { %p3010_p9 = pnand %p3515_p5, %p3008_p4  ;;  %p3015_p12 = por %p3014_p8, %p3013_p6 }
  0x72   : > { %p3011_p13 = pneg %p3010_p9  ;;  %p3017_p10 = por %p3016_p1, %p3015_p12 }
  0x74   : > { %p3018_p7 = pnand %p3017_p10, %p3011_p13 }
  0x76   : > { %3021 = shalt.err (!%p3018_p7)
}
  0x77   : > { %s3022_s15 = scalar_lea.vmem %s3505_s16, 2048  ;;  %s3278_s23 = smov [#allocation7]  }
  0x78   : > { %p3023_p4 = scmp.ne.s32.totalorder %s3505_s16, %s3022_s15  ;;  %s3027_s29 = sshll.u32 %s3278_s23, 4  ;;  %s3028_s29 = int_to_ptr.vmem [resolvable:$false] %s3027_s29 }
  0x79   : > { %s3029_s19 = scalar_lea.vmem %s3028_s29, 4096  ;;  %p3030_p0 = scmp.lt.s32.totalorder %s3505_s16, %s3028_s29 }
  0x7a   : > { %p3025_p9 = pnand %p3023_p4, %p3515_p5  ;;  %p3031_p2 = scmp.lt.s32.totalorder %s3029_s19, %s3022_s15 }
  0x7c   : > { %p3026_p11 = pneg %p3025_p9  ;;  %p3032_p6 = por %p3031_p2, %p3030_p0 }
  0x7e   : > { %p3033_p8 = pnand %p3032_p6, %p3026_p11 }
  0x80   : > { %3036 = shalt.err (!%p3033_p8)
}
  0x81   : > { %s4109_s6 = smov 8   ;;  %s4110_s11 = smov 128  }
  0x82   : > { %2877 = dma.hbm_to_vmem [thread:$0]  (!%p3495_p3), %s3503_s14, 2048, %s3505_s16, %s3509_s5, %s4110_s11, %s4110_s11, %s4109_s6  }
  0x83   : > { %s3279_s18 = smov [#allocation15]   ;;  %s3280_s23 = smov [#allocation16]  }
  0x84   : > { %s316_s2 = sshll.u32 %s3279_s18, 4  ;;  %s329_s25 = sshll.u32 %s3280_s23, 4  ;;  %s317_s2 = int_to_ptr.vmem [resolvable:$true] %s316_s2  ;;  %s330_s25 = int_to_ptr.vmem [resolvable:$true] %s329_s25 }
  0x85   : > { %s3037_s19 = scalar_lea.hbm %s4057_s7, 2048  ;;  %p4111_p11 = scmp.ne.s32.totalorder %s4099_s21, 0 }
  0x86   : > { %p3038_p7 = scmp.ne.s32.totalorder %s4057_s7, %s3037_s19  ;;  %p3044_p10 = scmp.lt.u32.totalorder %s3037_s19, %s4057_s7 }
  0x88   : > { %p3040_p0 = pnand %p3038_p7, %p4111_p11 }
  0x8a   : > { %p3041_p2 = pneg %p3040_p0 }
  0x8c   : > { %p3046_p13 = pnand %p3044_p10, %p3041_p2 }
  0x8e   : > { %3049 = shalt.err (!%p3046_p13)
}
  0x8f   : > { %s3050_s14 = scalar_lea.vmem %s317_s2, 2048  ;;  %p3058_p9 = scmp.lt.s32.totalorder %s317_s2, %s317_s2 }
  0x90   : > { %p3051_p12 = scmp.ne.s32.totalorder %s317_s2, %s3050_s14  ;;  %p3059_p6 = scmp.lt.s32.totalorder %s3050_s14, %s3050_s14 }
  0x92   : > { %p3053_p1 = pnand %p3051_p12, %p4111_p11  ;;  %p3060_p8 = por %p3059_p6, %p3058_p9 }
  0x94   : > { %p3054_p4 = pneg %p3053_p1 }
  0x96   : > { %p3061_p3 = pnand %p3060_p8, %p3054_p4 }
  0x98   : > { %3064 = shalt.err (!%p3061_p3)
}
  0x99   : > { %p4112_p7 = scmp.ne.s32.totalorder %s4097_s13, 0  ;;  %s3065_s20 = scalar_lea.hbm %s4058_s8, 2048 }
  0x9a   : > { %p3066_p0 = scmp.ne.s32.totalorder %s4058_s8, %s3065_s20  ;;  %p3072_p10 = scmp.lt.u32.totalorder %s3065_s20, %s4058_s8 }
  0x9b   : > { %2867 = dma.hbm_to_vmem [thread:$0]  (!%p4112_p7), %s4057_s7, 2048, %s317_s2, [#allocation14], %s4110_s11, %s4110_s11, %s4109_s6  }
  0x9c   : > { %p3068_p3 = pnand %p3066_p0, %p4111_p11 }
  0x9e   : > { %p3069_p2 = pneg %p3068_p3 }
  0xa0   : > { %p3074_p13 = pnand %p3072_p10, %p3069_p2 }
  0xa2   : > { %3077 = shalt.err (!%p3074_p13)
}
  0xa3   : > { %s3078_s19 = scalar_lea.vmem %s330_s25, 2048  ;;  %p3086_p9 = scmp.lt.s32.totalorder %s330_s25, %s330_s25 }
  0xa4   : > { %p3079_p12 = scmp.ne.s32.totalorder %s330_s25, %s3078_s19  ;;  %p3087_p6 = scmp.lt.s32.totalorder %s3078_s19, %s3078_s19 }
  0xa6   : > { %p3081_p1 = pnand %p3079_p12, %p4111_p11  ;;  %p3088_p8 = por %p3087_p6, %p3086_p9 }
  0xa8   : > { %p3082_p4 = pneg %p3081_p1 }
  0xaa   : > { %p3089_p5 = pnand %p3088_p8, %p3082_p4 }
  0xac   : > { %3092 = shalt.err (!%p3089_p5)
}
  0xad   : > { %2870 = dma.hbm_to_vmem [thread:$0]  (!%p4112_p7), %s4058_s8, 2048, %s330_s25, [#allocation17], %s4110_s11, %s4110_s11, %s4109_s6  }
  0xae   : > { %s1899_s21 = sshll.u32 %s3491_s27, 4  ;;  %s1927_s9 = sshll.u32 %s3271_s0, 8 }
  0xaf   : > { %s3589_s17 = scalar_lea.hbm %s4051_s1, %s1927_s9  ;;  %s350_s13 = scalar_lea.vmem [#allocation4], %s1899_s21 }
  0xb0   : > { %s357_s20 = sshll.u32 %s350_s13, 4  ;;  %s1905_s18 = sshll.u32 %s3491_s27, 3  ;;  %s3592_s20 = int_to_ptr.vmem [resolvable:$true] %s357_s20 }
  0xb1   : > { %s347_s23 = scalar_lea.sflag [#allocation5], %s3491_s27  ;;  %s3093_s29 = scalar_lea.hbm %s3589_s17, 256 }
  0xb2   : > { %p3094_p5 = scmp.ne.s32.totalorder %s3589_s17, %s3093_s29  ;;  %p4113_p11 = scmp.ne.s32.totalorder %s4108_s22, 0 }
  0xb3   : > { %s3098_s19 = scalar_lea.hbm %s4051_s1, 512  ;;  %p3099_p3 = scmp.lt.u32.totalorder %s3589_s17, %s4051_s1 }
  0xb4   : > { %p3096_p7 = pnand %p3094_p5, %p4113_p11  ;;  %p3100_p2 = scmp.lt.u32.totalorder %s3098_s19, %s3093_s29 }
  0xb5   : > { %p3102_p13 = scmp.lt.u32.totalorder %s3093_s29, %s3589_s17 }
  0xb6   : > { %p3097_p0 = pneg %p3096_p7  ;;  %p3101_p10 = por %p3100_p2, %p3099_p3 }
  0xb8   : > { %p3103_p12 = por %p3102_p13, %p3101_p10 }
  0xba   : > { %p3104_p1 = pnand %p3103_p12, %p3097_p0 }
  0xbc   : > { %3107 = shalt.err (!%p3104_p1)
}
  0xbd   : > { %s3108_s21 = scalar_lea.vmem %s3592_s20, 256  ;;  %s3281_s9 = smov [#allocation4]  }
  0xbe   : > { %p3109_p4 = scmp.ne.s32.totalorder %s3592_s20, %s3108_s21  ;;  %s3113_s10 = sshll.u32 %s3281_s9, 4  ;;  %s3114_s10 = int_to_ptr.vmem [resolvable:$false] %s3113_s10 }
  0xbf   : > { %s3115_s16 = scalar_lea.vmem %s3114_s10, 512  ;;  %p3116_p8 = scmp.lt.s32.totalorder %s3592_s20, %s3114_s10 }
  0xc0   : > { %p3111_p9 = pnand %p3109_p4, %p4113_p11  ;;  %p3117_p5 = scmp.lt.s32.totalorder %s3115_s16, %s3108_s21 }
  0xc2   : > { %p3112_p6 = pneg %p3111_p9  ;;  %p3118_p7 = por %p3117_p5, %p3116_p8 }
  0xc4   : > { %p3119_p3 = pnand %p3118_p7, %p3112_p6 }
  0xc6   : > { %3122 = shalt.err (!%p3119_p3)
}
  0xc7   : > { %p4114_p0 = scmp.ne.s32.totalorder %s4106_s12, 0  ;;  %s1929_s13 = sshll.u32 %s3271_s0, 7 }
  0xc8   : > { %s392_s29 = scalar_lea.vmem [#allocation9], %s1905_s18  ;;  %s3627_s2 = scalar_lea.hbm %s4053_s3, %s1929_s13 }
  0xc9   : > { %2874 = dma.hbm_to_vmem [thread:$0]  (!%p4114_p0), %s3589_s17, 256, %s3592_s20, %s347_s23, %s4110_s11, %s4110_s11, %s4109_s6  }
  0xca   : > { %s399_s25 = sshll.u32 %s392_s29, 4  ;;  %s3123_s14 = scalar_lea.hbm %s3627_s2, 128  ;;  %s3629_s25 = int_to_ptr.vmem [resolvable:$true] %s399_s25 }
  0xcb   : > { %p3124_p2 = scmp.ne.s32.totalorder %s3627_s2, %s3123_s14  ;;  %s3128_s17 = scalar_lea.hbm %s4053_s3, 256 }
  0xcc   : > { %p3129_p12 = scmp.lt.u32.totalorder %s3627_s2, %s4053_s3  ;;  %p3130_p1 = scmp.lt.u32.totalorder %s3128_s17, %s3123_s14 }
  0xcd   : > { %p3126_p10 = pnand %p3124_p2, %p4113_p11  ;;  %p3132_p9 = scmp.lt.u32.totalorder %s3123_s14, %s3627_s2 }
  0xce   : > { %p3131_p4 = por %p3130_p1, %p3129_p12 }
  0xcf   : > { %p3127_p13 = pneg %p3126_p10 }
  0xd0   : > { %p3133_p6 = por %p3132_p9, %p3131_p4 }
  0xd2   : > { %p3134_p8 = pnand %p3133_p6, %p3127_p13 }
  0xd4   : > { %3137 = shalt.err (!%p3134_p8)
}
  0xd5   : > { %s3138_s23 = scalar_lea.vmem %s3629_s25, 128  ;;  %s3282_s21 = smov [#allocation9]  }
  0xd6   : > { %p3139_p5 = scmp.ne.s32.totalorder %s3629_s25, %s3138_s23  ;;  %s3143_s9 = sshll.u32 %s3282_s21, 4  ;;  %s3144_s9 = int_to_ptr.vmem [resolvable:$false] %s3143_s9 }
  0xd7   : > { %s3145_s10 = scalar_lea.vmem %s3144_s9, 256  ;;  %p3146_p2 = scmp.lt.s32.totalorder %s3629_s25, %s3144_s9 }
  0xd8   : > { %p3141_p7 = pnand %p3139_p5, %p4113_p11  ;;  %p3147_p10 = scmp.lt.s32.totalorder %s3145_s10, %s3138_s23 }
  0xda   : > { %p3142_p3 = pneg %p3141_p7  ;;  %p3148_p12 = por %p3147_p10, %p3146_p2 }
  0xdc   : > { %p3149_p1 = pnand %p3148_p12, %p3142_p3 }
  0xde   : > { %3152 = shalt.err (!%p3149_p1)
}
  0xdf   : > { %s3283_s16 = smov 64   ;;  %s3284_s13 = smov 4  }
  0xe0   : > { %2880 = dma.hbm_to_vmem [thread:$0]  (!%p4114_p0), %s3627_s2, 128, %s3629_s25, %s3509_s5, %s3283_s16, %s3283_s16, %s3284_s13  }
  0xe1   : > { %s1908_s29 = sshll.u32 %s3491_s27, 6  ;;  %s1930_s15 = sshll.u32 %s3271_s0, 10 }
  0xe2   : > { %s3661_s6 = scalar_lea.hbm %s4054_s4, %s1930_s15  ;;  %s413_s11 = scalar_lea.vmem [#allocation10], %s1908_s29 }
  0xe3   : > { %s420_s17 = sshll.u32 %s413_s11, 4  ;;  %s4115_s20 = sand.u32 1, %s3271_s0   ;;  %s3663_s17 = int_to_ptr.vmem [resolvable:$true] %s420_s17 }
  0xe4   : > { %s3667_s18 = scalar_lea.sflag [#allocation11], %s4115_s20  ;;  %s3153_s23 = scalar_lea.hbm %s3661_s6, 1024 }
  0xe5   : > { %p3154_p13 = scmp.ne.s32.totalorder %s3661_s6, %s3153_s23  ;;  %s3158_s25 = scalar_lea.hbm %s4054_s4, 2048 }
  0xe6   : > { %p3159_p6 = scmp.lt.u32.totalorder %s3661_s6, %s4054_s4  ;;  %p3160_p8 = scmp.lt.u32.totalorder %s3158_s25, %s3153_s23 }
  0xe7   : > { %p3156_p4 = pnand %p3154_p13, %p4113_p11  ;;  %p3162_p7 = scmp.lt.u32.totalorder %s3153_s23, %s3661_s6 }
  0xe8   : > { %p3161_p5 = por %p3160_p8, %p3159_p6 }
  0xe9   : > { %p3157_p9 = pneg %p3156_p4 }
  0xea   : > { %p3163_p3 = por %p3162_p7, %p3161_p5 }
  0xec   : > { %p3164_p2 = pnand %p3163_p3, %p3157_p9 }
  0xee   : > { %3167 = shalt.err (!%p3164_p2)
}
  0xef   : > { %s3168_s9 = scalar_lea.vmem %s3663_s17, 1024  ;;  %s3285_s10 = smov [#allocation10]  }
  0xf0   : > { %p3169_p10 = scmp.ne.s32.totalorder %s3663_s17, %s3168_s9  ;;  %s3173_s29 = sshll.u32 %s3285_s10, 4  ;;  %s3174_s29 = int_to_ptr.vmem [resolvable:$false] %s3173_s29 }
  0xf1   : > { %s3175_s15 = scalar_lea.vmem %s3174_s29, 2048  ;;  %p3176_p13 = scmp.lt.s32.totalorder %s3663_s17, %s3174_s29 }
  0xf2   : > { %p3171_p12 = pnand %p3169_p10, %p4113_p11  ;;  %p3177_p4 = scmp.lt.s32.totalorder %s3175_s15, %s3168_s9 }
  0xf4   : > { %p3172_p1 = pneg %p3171_p12  ;;  %p3178_p6 = por %p3177_p4, %p3176_p13 }
  0xf6   : > { %p3179_p8 = pnand %p3178_p6, %p3172_p1 }
  0xf8   : > { %3182 = shalt.err (!%p3179_p8)
}
  0xf9   : > { %2883 = dma.hbm_to_vmem [thread:$0]  (!%p4114_p0), %s3661_s6, 1024, %s3663_s17, %s3667_s18, %s3283_s16, %s3283_s16, %s3284_s13  }
  0xfa   : > { %p4116_p11 = scmp.ne.s32.totalorder %s4096_s30, 0 }
  0xfb   : > { %s3697_s22 = sand.u32 (!%p4116_p11), 1, %s3263_s24   ;;  %p4117_p9 = scmp.ne.s32.totalorder (!%p4116_p11), %s4093_s28, 0 }
  0xfc   : > { %432 = sbr.rel (%p4116_p11) target bundleno = 1969 (0x7b1), region = 56  ;;  %s1912_s19 = sshll.u32 (!%p4116_p11), %s3697_s22, 4 }
  0xfd   : > { %s435_s14 = scalar_lea.sflag (!%p4116_p11), [#allocation5], %s3697_s22  ;;  %s3703_s12 = scalar_lea.vmem (!%p4116_p11), [#allocation4], %s1912_s19 }
 0x103   : > { %3230 = dma.done.wait (%p4117_p9), %s435_s14, 256  }
 0x104   : > { %3232 = vsyncadd (%p4117_p9), %s435_s14, 4294967040  ;;  %s443_s30 = sand.u32 1, %s3377_s26   ;;  %s1913_s16 = sshll.u32 %s3697_s22, 7 }
 0x105   : > { %s444_s13 = scalar_lea.sflag [#allocation8], %s443_s30  ;;  %s3711_s6 = scalar_lea.vmem [#allocation7], %s1913_s16 }
 0x106   : > { %3234 = dma.done.wait (%p4117_p9), %s444_s13, 2176  }
 0x107   : > { %3236 = vsyncadd (%p4117_p9), %s444_s13, 4294965120  ;;  %s1914_s11 = sshll.u32 %s3697_s22, 3  ;;  %s1915_s17 = sshll.u32 %s3697_s22, 6 }
 0x108   : > { %s3719_s20 = scalar_lea.vmem [#allocation9], %s1914_s11  ;;  %s462_s18 = scalar_lea.sflag [#allocation11], %s443_s30 }
 0x109   : > { %s3721_s23 = scalar_lea.vmem [#allocation10], %s1915_s17 }
 0x10a   : > { %3238 = dma.done.wait (%p4117_p9), %s462_s18, 1024  }
 0x10b   : > { %3240 = vsyncadd (%p4117_p9), %s462_s18, 4294966272  ;;  %p4118_p0 = scmp.eq.s32.totalorder %s3377_s26, 0 }
 0x10d   : > { %3242 = dma.done.wait (%p4118_p0), [#allocation11], 2048   ;;  %p4119_p5 = pmov %p4118_p0 }
 0x10e   : > { %p4120_p7 = pmov %p4118_p0 }
 0x10f   : > { %3244 = vsyncadd (%p4119_p5), [#allocation11], 4294965248 }
 0x110   : > { %3246 = dma.done.wait (%p4120_p7), [#allocation14], 4096   ;;  %p4121_p3 = pmov %p4118_p0 }
 0x111   : > { %p4122_p2 = pmov %p4118_p0 }
 0x112   : > { %3248 = vsyncadd (%p4121_p3), [#allocation14], 4294963200 }
 0x113   : > { %3250 = dma.done.wait (%p4122_p2), [#allocation17], 2048   ;;  %p4123_p10 = pmov %p4118_p0 }
 0x114   : > { %v547_v0 = vld [vmem:[#allocation12] sm:$0xff]  ;;  %v548_v1 = vld [vmem:[#allocation12 + $0x8] sm:$0xff]  ;;  %v549_v2 = vld [vmem:[#allocation12 + $0x10] sm:$0xff]  ;;  %s1690_s28 = sld [smem:[#allocation3 + %s3377_s26]]  ;;  %s530_s2 = scalar_lea.vmem [#allocation18], %s1912_s19 }
 0x115   : > { %3252 = vsyncadd (%p4123_p10), [#allocation17], 4294965248  ;;  %v2574_v3 = vpack.c.bf16 %v548_v1, %v547_v0  ;;  %v550_v4 = vld [vmem:[#allocation12 + $0x18] sm:$0xff]  ;;  %v551_v6 = vld [vmem:[#allocation12 + $0x20] sm:$0xff]  ;;  %s4124_s25 = sld [smem:[#allocation36_spill]]  ;;  %s1715_s21 = sshll.u32 %s530_s2, 4  ;;  %s4001_s21 = int_to_ptr.vmem [resolvable:$true] %s1715_s21 }
 0x116   : > { %v2578_v5 = vpack.c.bf16 %v550_v4, %v549_v2  ;;  %v552_v7 = vld [vmem:[#allocation12 + $0x28] sm:$0xff]  ;;  %v531_v9 = vld [vmem:[%s3711_s6] sm:$0xff]  ;;  %v554_v11 = vld [vmem:[#allocation12 + $0x38] sm:$0xff]  ;;  %s4125_s9 = sld [smem:[#allocation31_spill]]  ;;  %s1931_s10 = sshll.u32 %s3377_s26, 8 }
 0x117   : > { %2575 = vmatprep.subr.bf16.mxu1 %v2574_v3  ;;  %v2582_v8 = vpack.c.bf16 %v552_v7, %v551_v6  ;;  %v553_v10 = vld [vmem:[#allocation12 + $0x30] sm:$0xff]  ;;  %2221 = vmatprep.mubr.f32.mxu1 %v531_v9  ;;  %v555_v13 = vld [vmem:[#allocation12 + $0x40] sm:$0xff]  ;;  %v556_v14 = vld [vmem:[#allocation12 + $0x48] sm:$0xff]  ;;  %s4126_s14 = sld [smem:[#allocation37_spill]]  ;;  %s1702_s26 = scalar_lea.sflag [#allocation6], %s3697_s22 }
 0x118   : > { %2577 = vmatpush3.bf16.msra.mxu1 %v2574_v3  ;;  %v2586_v12 = vpack.c.bf16 %v554_v11, %v553_v10  ;;  %v2590_v15 = vpack.c.bf16 %v556_v14, %v555_v13  ;;  %v557_v16 = vld [vmem:[#allocation12 + $0x50] sm:$0xff]  ;;  %v558_v17 = vld [vmem:[#allocation12 + $0x58] sm:$0xff]  ;;  %v559_v19 = vld [vmem:[#allocation12 + $0x60] sm:$0xff]  ;;  %s3286_s30 = smov [#allocation18]  }
 0x119   : > { %2579 = vmatprep.subr.bf16.mxu1 %v2578_v5  ;;  %v2594_v18 = vpack.c.bf16 %v558_v17, %v557_v16  ;;  %v560_v20 = vld [vmem:[#allocation12 + $0x68] sm:$0xff]  ;;  %v561_v22 = vld [vmem:[#allocation12 + $0x70] sm:$0xff]  ;;  %v562_v23 = vld [vmem:[#allocation12 + $0x78] sm:$0xff]  ;;  %s3187_s16 = sshll.u32 %s3286_s30, 4  ;;  %s3188_s16 = int_to_ptr.vmem [resolvable:$false] %s3187_s16 }
 0x11a   : > { %v2598_v21 = vpack.c.bf16 %v560_v20, %v559_v19  ;;  %v2602_v24 = vpack.c.bf16 %v562_v23, %v561_v22  ;;  %v532_v25 = vld [vmem:[%s3711_s6 + $0x8] sm:$0xff]  ;;  %v533_v26 = vld [vmem:[%s3711_s6 + $0x10] sm:$0xff]  ;;  %v534_v27 = vld [vmem:[%s3711_s6 + $0x18] sm:$0xff]  ;;  %s3189_s13 = scalar_lea.vmem %s3188_s16, 512  ;;  %p3190_p6 = scmp.lt.s32.totalorder %s4001_s21, %s3188_s16 }
 0x11b   : > { %v535_v28 = vld [vmem:[%s3711_s6 + $0x20] sm:$0xff]  ;;  %v536_v29 = vld [vmem:[%s3711_s6 + $0x28] sm:$0xff]  ;;  %v537_v30 = vld [vmem:[%s3711_s6 + $0x30] sm:$0xff] }
 0x11c   : > { %2581 = vmatpush3.bf16.msra.mxu1 %v2578_v5  ;;  %v538_v31 = vld [vmem:[%s3711_s6 + $0x38] sm:$0xff]  ;;  %v539_v32 = vld [vmem:[%s3711_s6 + $0x40] sm:$0xff]  ;;  %v540_v33 = vld [vmem:[%s3711_s6 + $0x48] sm:$0xff]  ;;  %p4127_p1 = scmp.ne.s32.totalorder %s4125_s9, 0 }
 0x11d   : > { %2583 = vmatprep.subr.bf16.mxu1 %v2582_v8  ;;  %v541_v34 = vld [vmem:[%s3711_s6 + $0x50] sm:$0xff]  ;;  %v542_v35 = vld [vmem:[%s3711_s6 + $0x58] sm:$0xff]  ;;  %v543_v36 = vld [vmem:[%s3711_s6 + $0x60] sm:$0xff]  ;;  %s4006_s19 = scalar_lea.hbm %s4126_s14, %s1931_s10 }
 0x11e   : > { %v544_v37 = vld [vmem:[%s3711_s6 + $0x68] sm:$0xff]  ;;  %v545_v38 = vld [vmem:[%s3711_s6 + $0x70] sm:$0xff]  ;;  %v546_v39 = vld [vmem:[%s3711_s6 + $0x78] sm:$0xff] }
 0x11f   : > { %v3756_v40 = vld [vmem:[%s3721_s23] sm:$0xff]   ;;  %v757_v43 = vld [vmem:[#allocation13 + $0x8] sm:$0xff]  ;;  %v758_v44 = vld [vmem:[#allocation13 + $0x10] sm:$0xff] }
 0x120   : > { %2585 = vmatpush3.bf16.msra.mxu1 %v2582_v8  ;;  %v1934_v41 = vunpack.c.l.bf16 %v3756_v40  ;;  %v756_v42 = vld [vmem:[#allocation13] sm:$0xff]  ;;  %v759_v46 = vld [vmem:[#allocation13 + $0x18] sm:$0xff]  ;;  %v761_v49 = vld [vmem:[#allocation13 + $0x28] sm:$0xff] }
 0x121   : > { %2587 = vmatprep.subr.bf16.mxu1 %v2586_v12  ;;  %v3761_v45 = vpack.c.bf16 %v757_v43, %v756_v42  ;;  %v3763_v47 = vpack.c.bf16 %v759_v46, %v758_v44  ;;  %v760_v48 = vld [vmem:[#allocation13 + $0x20] sm:$0xff]  ;;  %v762_v51 = vld [vmem:[#allocation13 + $0x30] sm:$0xff]  ;;  %v763_v52 = vld [vmem:[#allocation13 + $0x38] sm:$0xff]  ;;  %v1935_v46 = vunpack.c.h.bf16 %v3756_v40 }
 0x122   : > { %v3768_v50 = vpack.c.bf16 %v761_v49, %v760_v48  ;;  %v3772_v53 = vpack.c.bf16 %v763_v52, %v762_v51  ;;  %v764_v54 = vld [vmem:[#allocation13 + $0x40] sm:$0xff]  ;;  %v765_v55 = vld [vmem:[#allocation13 + $0x48] sm:$0xff]  ;;  %v766_v57 = vld [vmem:[#allocation13 + $0x50] sm:$0xff] }
 0x123   : > { %2639 = vmatprep.subr.bf16.mxu0 %v3761_v45  ;;  %v3776_v56 = vpack.c.bf16 %v765_v55, %v764_v54  ;;  %v767_v58 = vld [vmem:[#allocation13 + $0x58] sm:$0xff]  ;;  %v768_v60 = vld [vmem:[#allocation13 + $0x60] sm:$0xff]  ;;  %v769_v61 = vld [vmem:[#allocation13 + $0x68] sm:$0xff] }
 0x124   : > { %2589 = vmatpush3.bf16.msra.mxu1 %v2586_v12  ;;  %2641 = vmatpush3.bf16.msra.mxu0 %v3761_v45  ;;  %v3780_v59 = vpack.c.bf16 %v767_v58, %v766_v57  ;;  %v3784_v62 = vpack.c.bf16 %v769_v61, %v768_v60  ;;  %v770_v63 = vld [vmem:[#allocation13 + $0x70] sm:$0xff]  ;;  %v771_v0 = vld [vmem:[#allocation13 + $0x78] sm:$0xff]  ;;  %v3843_v44 = vld [vmem:[%s3721_s23 + $0x8] sm:$0xff]  }
 0x125   : > { %2591 = vmatprep.subr.bf16.mxu1 %v2590_v15  ;;  %2643 = vmatprep.subr.bf16.mxu0 %v3763_v47  ;;  %v3788_v1 = vpack.c.bf16 %v771_v0, %v770_v63  ;;  %v1938_v48 = vunpack.c.l.bf16 %v3843_v44  ;;  %v3848_v49 = vld [vmem:[%s3721_s23 + $0x10] sm:$0xff]   ;;  %v1939_v51 = vunpack.c.h.bf16 %v3843_v44  ;;  %v3857_v54 = vld [vmem:[%s3721_s23 + $0x18] sm:$0xff]   ;;  %v3866_v58 = vld [vmem:[%s3721_s23 + $0x20] sm:$0xff]  }
 0x126   : > { %v1942_v52 = vunpack.c.l.bf16 %v3848_v49  ;;  %v1943_v55 = vunpack.c.h.bf16 %v3848_v49  ;;  %v1946_v57 = vunpack.c.l.bf16 %v3857_v54  ;;  %v1947_v60 = vunpack.c.h.bf16 %v3857_v54  ;;  %v3875_v63 = vld [vmem:[%s3721_s23 + $0x28] sm:$0xff]  }
 0x127   : > { %v1950_v61 = vunpack.c.l.bf16 %v3866_v58  ;;  %v1951_v0 = vunpack.c.h.bf16 %v3866_v58 }
 0x128   : > { %2593 = vmatpush3.bf16.msra.mxu1 %v2590_v15  ;;  %2645 = vmatpush3.bf16.msra.mxu0 %v3763_v47 }
 0x129   : > { %2595 = vmatprep.subr.bf16.mxu1 %v2594_v18  ;;  %2647 = vmatprep.subr.bf16.mxu0 %v3768_v50 }
 0x12c   : > { %2597 = vmatpush3.bf16.msra.mxu1 %v2594_v18  ;;  %2649 = vmatpush3.bf16.msra.mxu0 %v3768_v50 }
 0x12d   : > { %2599 = vmatprep.subr.bf16.mxu1 %v2598_v21  ;;  %2651 = vmatprep.subr.bf16.mxu0 %v3772_v53 }
 0x130   : > { %2601 = vmatpush3.bf16.msra.mxu1 %v2598_v21  ;;  %2653 = vmatpush3.bf16.msra.mxu0 %v3772_v53 }
 0x131   : > { %2603 = vmatprep.subr.bf16.mxu1 %v2602_v24  ;;  %2655 = vmatprep.subr.bf16.mxu0 %v3776_v56 }
 0x134   : > { %2605 = vmatpush3.bf16.msra.mxu1 %v2602_v24  ;;  %2657 = vmatpush3.bf16.msra.mxu0 %v3776_v56 }
 0x135   : > { %2659 = vmatprep.subr.bf16.mxu0 %v3780_v59 }
 0x137   : > { %2222 = vmatmul.mubr.f32.vlgmr.msra.gmra.mrb[0].mxu1 %v532_v25 }
 0x138   : > { %2224 = vmatprep.mubr.f32.mxu1 %v533_v26  ;;  %2661 = vmatpush3.bf16.msra.mxu0 %v3780_v59 }
 0x139   : > { %2663 = vmatprep.subr.bf16.mxu0 %v3784_v62 }
 0x13b   : > { %2225 = vmatmul.mubr.f32.gmra.mrb[2].mxu1 %v534_v27 }
 0x13c   : > { %2227 = vmatprep.mubr.f32.mxu1 %v535_v28  ;;  %2665 = vmatpush3.bf16.msra.mxu0 %v3784_v62 }
 0x13d   : > { %2667 = vmatprep.subr.bf16.mxu0 %v3788_v1 }
 0x13f   : > { %2228 = vmatmul.mubr.f32.gmra.mrb[4].mxu1 %v536_v29 }
 0x140   : > { %2230 = vmatprep.mubr.f32.mxu1 %v537_v30  ;;  %2669 = vmatpush3.bf16.msra.mxu0 %v3788_v1 }
 0x141   : > { %2703 = vmatprep.subr.bf16.mxu0 %v3761_v45 }
 0x143   : > { %2231 = vmatmul.mubr.f32.gmra.mrb[6].mxu1 %v538_v31 }
 0x144   : > { %2233 = vmatprep.mubr.f32.mxu1 %v539_v32 }
 0x147   : > { %2234 = vmatmul.mubr.f32.gmra.mrb[8].mxu1 %v540_v33 }
 0x148   : > { %2236 = vmatprep.mubr.f32.mxu1 %v541_v34 }
 0x14b   : > { %2237 = vmatmul.mubr.f32.gmra.mrb[10].mxu1 %v542_v35 }
 0x14c   : > { %2239 = vmatprep.mubr.f32.mxu1 %v543_v36 }
 0x14f   : > { %2240 = vmatmul.mubr.f32.gmra.mrb[12].mxu1 %v544_v37 }
 0x150   : > { %2242 = vmatprep.mubr.f32.mxu1 %v545_v38 }
 0x153   : > { %2243 = vmatmul.mubr.f32.gmra.mrb[14].mxu1 %v546_v39 }
 0x154   : > { %2277 = vmatprep.mubr.f32.mxu1 %v1934_v41 }
 0x20a   : > { %v3794_v2 = vpop.f32.mrb[0].mxu1 }
 0x20b   : > { %v709_v3 = vmax.f32 %v3794_v2, 0.0  ;;  %v3797_v4 = vpop.f32.mrb[1].mxu1 }
 0x20c   : > { %v708_v5 = vmax.f32 %v3797_v4, 0.0 }
 0x20e   : > { %v3800_v6 = vpop.f32.mrb[2].mxu1  ;;  %v2606_v7 = vpack.c.bf16 %v709_v3, %v708_v5  ;;  %v1954_v3 = vunpack.c.l.bf16 %v3875_v63  ;;  %v3884_v5 = vld [vmem:[%s3721_s23 + $0x30] sm:$0xff]  }
 0x20f   : > { %v711_v8 = vmax.f32 %v3800_v6, 0.0  ;;  %v3803_v9 = vpop.f32.mrb[3].mxu1 }
 0x210   : > { %v710_v10 = vmax.f32 %v3803_v9, 0.0  ;;  %2607 = vmatprep.subr.bf16.mxu1 %v2606_v7 }
 0x211   : > { %2609 = vmatpush3.bf16.msra.mxu1 %v2606_v7  ;;  %v1955_v7 = vunpack.c.h.bf16 %v3875_v63 }
 0x212   : > { %v3806_v11 = vpop.f32.mrb[4].mxu1  ;;  %v2610_v12 = vpack.c.bf16 %v711_v8, %v710_v10  ;;  %v1958_v8 = vunpack.c.l.bf16 %v3884_v5  ;;  %v3893_v10 = vld [vmem:[%s3721_s23 + $0x38] sm:$0xff]  }
 0x213   : > { %v713_v13 = vmax.f32 %v3806_v11, 0.0  ;;  %v3809_v14 = vpop.f32.mrb[5].mxu1 }
 0x214   : > { %v712_v15 = vmax.f32 %v3809_v14, 0.0  ;;  %2611 = vmatprep.subr.bf16.mxu1 %v2610_v12 }
 0x215   : > { %2613 = vmatpush3.bf16.msra.mxu1 %v2610_v12  ;;  %v1959_v12 = vunpack.c.h.bf16 %v3884_v5  ;;  %v3972_v5 = vld [vmem:[%s3719_s20] sm:$0xff]  }
 0x216   : > { %v3812_v16 = vpop.f32.mrb[6].mxu1  ;;  %v2614_v17 = vpack.c.bf16 %v713_v13, %v712_v15  ;;  %v1962_v13 = vunpack.c.l.bf16 %v3893_v10  ;;  %v1963_v15 = vunpack.c.h.bf16 %v3893_v10  ;;  %v1514_v10 = vld [vmem:[#allocation16 + $0x8] sm:$0xff] }
 0x217   : > { %v715_v18 = vmax.f32 %v3812_v16, 0.0  ;;  %v3815_v19 = vpop.f32.mrb[7].mxu1 }
 0x218   : > { %v714_v20 = vmax.f32 %v3815_v19, 0.0  ;;  %2615 = vmatprep.subr.bf16.mxu1 %v2614_v17 }
 0x219   : > { %2617 = vmatpush3.bf16.msra.mxu1 %v2614_v17 }
 0x21a   : > { %v3818_v21 = vpop.f32.mrb[8].mxu1  ;;  %v2618_v22 = vpack.c.bf16 %v715_v18, %v714_v20 }
 0x21b   : > { %v717_v23 = vmax.f32 %v3818_v21, 0.0  ;;  %v3821_v24 = vpop.f32.mrb[9].mxu1 }
 0x21c   : > { %v716_v25 = vmax.f32 %v3821_v24, 0.0  ;;  %2619 = vmatprep.subr.bf16.mxu1 %v2618_v22 }
 0x21d   : > { %2621 = vmatpush3.bf16.msra.mxu1 %v2618_v22 }
 0x21e   : > { %v3824_v26 = vpop.f32.mrb[10].mxu1  ;;  %v2622_v27 = vpack.c.bf16 %v717_v23, %v716_v25 }
 0x21f   : > { %v719_v28 = vmax.f32 %v3824_v26, 0.0  ;;  %v3827_v29 = vpop.f32.mrb[11].mxu1 }
 0x220   : > { %v718_v30 = vmax.f32 %v3827_v29, 0.0  ;;  %2623 = vmatprep.subr.bf16.mxu1 %v2622_v27 }
 0x221   : > { %2625 = vmatpush3.bf16.msra.mxu1 %v2622_v27 }
 0x222   : > { %v3830_v31 = vpop.f32.mrb[12].mxu1  ;;  %v2626_v32 = vpack.c.bf16 %v719_v28, %v718_v30 }
 0x223   : > { %v721_v33 = vmax.f32 %v3830_v31, 0.0  ;;  %v3833_v34 = vpop.f32.mrb[13].mxu1 }
 0x224   : > { %v720_v35 = vmax.f32 %v3833_v34, 0.0  ;;  %2627 = vmatprep.subr.bf16.mxu1 %v2626_v32 }
 0x225   : > { %2629 = vmatpush3.bf16.msra.mxu1 %v2626_v32 }
 0x226   : > { %v3836_v36 = vpop.f32.mrb[14].mxu1  ;;  %v2630_v37 = vpack.c.bf16 %v721_v33, %v720_v35 }
 0x227   : > { %v723_v38 = vmax.f32 %v3836_v36, 0.0  ;;  %v3839_v39 = vpop.f32.mrb[15].mxu1 }
 0x228   : > { %v722_v42 = vmax.f32 %v3839_v39, 0.0  ;;  %2631 = vmatprep.subr.bf16.mxu1 %v2630_v37 }
 0x229   : > { %2633 = vmatpush3.bf16.msra.mxu1 %v2630_v37 }
 0x22a   : > { %v2634_v43 = vpack.c.bf16 %v723_v38, %v722_v42 }
 0x22c   : > { %2635 = vmatprep.subr.bf16.mxu1 %v2634_v43 }
 0x22d   : > { %2637 = vmatpush3.bf16.msra.mxu1 %v2634_v43 }
 0x230   : > { %2278 = vmatmul.mubr.f32.vlgmr.msra.gmra.mrb[16].mxu1 %v1935_v46 }
 0x231   : > { %2280 = vmatprep.mubr.f32.mxu1 %v1938_v48 }
 0x234   : > { %2281 = vmatmul.mubr.f32.gmra.mrb[18].mxu1 %v1939_v51 }
 0x235   : > { %2283 = vmatprep.mubr.f32.mxu1 %v1942_v52 }
 0x238   : > { %2284 = vmatmul.mubr.f32.gmra.mrb[20].mxu1 %v1943_v55 }
 0x239   : > { %2286 = vmatprep.mubr.f32.mxu1 %v1946_v57 }
 0x23c   : > { %2287 = vmatmul.mubr.f32.gmra.mrb[22].mxu1 %v1947_v60 }
 0x23d   : > { %2289 = vmatprep.mubr.f32.mxu1 %v1950_v61 }
 0x240   : > { %2290 = vmatmul.mubr.f32.gmra.mrb[24].mxu1 %v1951_v0 }
 0x241   : > { %2292 = vmatprep.mubr.f32.mxu1 %v1954_v3 }
 0x244   : > { %2293 = vmatmul.mubr.f32.gmra.mrb[26].mxu1 %v1955_v7 }
 0x245   : > { %2295 = vmatprep.mubr.f32.mxu1 %v1958_v8 }
 0x248   : > { %2296 = vmatmul.mubr.f32.gmra.mrb[28].mxu1 %v1959_v12 }
 0x249   : > { %2298 = vmatprep.mubr.f32.mxu1 %v1962_v13 }
 0x24c   : > { %2299 = vmatmul.mubr.f32.gmra.mrb[30].mxu1 %v1963_v15 }
 0x24d   : > { %2389 = vmatprep.mubr.f32.mxu1 %v1934_v41 }
 0x303   : > { %v2279_v17 = vpop.f32.mrb[16].mxu1 }
 0x304   : > { %v838_v18 = vpop.f32.mrb[17].mxu1 }
 0x305   : > { %2333 = vmatprep.mubr.f32.mxu0 %v838_v18 }
 0x306   : > { %2334 = vmatmul.mubr.f32.vlgmr.msra.gmra.mrb[0].mxu0 %v2279_v17 }
 0x307   : > { %v2282_v20 = vpop.f32.mrb[18].mxu1  ;;  %2705 = vmatpush3.bf16.msra.mxu0 %v3761_v45 }
 0x308   : > { %v848_v22 = vpop.f32.mrb[19].mxu1  ;;  %2707 = vmatprep.subr.bf16.mxu0 %v3763_v47 }
 0x309   : > { %2336 = vmatprep.mubr.f32.mxu0 %v848_v22 }
 0x30a   : > { %2337 = vmatmul.mubr.f32.gmra.mrb[2].mxu0 %v2282_v20 }
 0x30b   : > { %v2285_v23 = vpop.f32.mrb[20].mxu1  ;;  %2709 = vmatpush3.bf16.msra.mxu0 %v3763_v47 }
 0x30c   : > { %v858_v25 = vpop.f32.mrb[21].mxu1  ;;  %2711 = vmatprep.subr.bf16.mxu0 %v3768_v50 }
 0x30d   : > { %2339 = vmatprep.mubr.f32.mxu0 %v858_v25 }
 0x30e   : > { %2340 = vmatmul.mubr.f32.gmra.mrb[4].mxu0 %v2285_v23 }
 0x30f   : > { %v2288_v41 = vpop.f32.mrb[22].mxu1  ;;  %2713 = vmatpush3.bf16.msra.mxu0 %v3768_v50 }
 0x310   : > { %v868_v27 = vpop.f32.mrb[23].mxu1  ;;  %2715 = vmatprep.subr.bf16.mxu0 %v3772_v53 }
 0x311   : > { %2342 = vmatprep.mubr.f32.mxu0 %v868_v27 }
 0x312   : > { %2343 = vmatmul.mubr.f32.gmra.mrb[6].mxu0 %v2288_v41 }
 0x313   : > { %v2291_v45 = vpop.f32.mrb[24].mxu1  ;;  %2717 = vmatpush3.bf16.msra.mxu0 %v3772_v53 }
 0x314   : > { %v878_v28 = vpop.f32.mrb[25].mxu1  ;;  %2719 = vmatprep.subr.bf16.mxu0 %v3776_v56 }
 0x315   : > { %2345 = vmatprep.mubr.f32.mxu0 %v878_v28 }
 0x316   : > { %2346 = vmatmul.mubr.f32.gmra.mrb[8].mxu0 %v2291_v45 }
 0x317   : > { %v2294_v47 = vpop.f32.mrb[26].mxu1  ;;  %2721 = vmatpush3.bf16.msra.mxu0 %v3776_v56 }
 0x318   : > { %v888_v30 = vpop.f32.mrb[27].mxu1  ;;  %2723 = vmatprep.subr.bf16.mxu0 %v3780_v59 }
 0x319   : > { %2348 = vmatprep.mubr.f32.mxu0 %v888_v30 }
 0x31a   : > { %2349 = vmatmul.mubr.f32.gmra.mrb[10].mxu0 %v2294_v47 }
 0x31b   : > { %v2297_v50 = vpop.f32.mrb[28].mxu1  ;;  %2725 = vmatpush3.bf16.msra.mxu0 %v3780_v59 }
 0x31c   : > { %v898_v32 = vpop.f32.mrb[29].mxu1  ;;  %2727 = vmatprep.subr.bf16.mxu0 %v3784_v62 }
 0x31d   : > { %2351 = vmatprep.mubr.f32.mxu0 %v898_v32 }
 0x31e   : > { %2352 = vmatmul.mubr.f32.gmra.mrb[12].mxu0 %v2297_v50 }
 0x31f   : > { %v2300_v53 = vpop.f32.mrb[30].mxu1  ;;  %2729 = vmatpush3.bf16.msra.mxu0 %v3784_v62 }
 0x320   : > { %v908_v33 = vpop.f32.mrb[31].mxu1  ;;  %2731 = vmatprep.subr.bf16.mxu0 %v3788_v1 }
 0x321   : > { %2354 = vmatprep.mubr.f32.mxu0 %v908_v33 }
 0x322   : > { %2355 = vmatmul.mubr.f32.gmra.mrb[14].mxu0 %v2300_v53 }
 0x323   : > { %2733 = vmatpush3.bf16.msra.mxu0 %v3788_v1 }
 0x3d9   : > { %v2335_v56 = vpop.f32.mrb[0].mxu0 }
 0x3da   : > { %v1063_v35 = vadd.f32 %v2335_v56, %v3794_v2  ;;  %v983_v37 = vpop.f32.mrb[1].mxu0 }
 0x3db   : > { %v1062_v59 = vadd.f32 %v983_v37, %v3797_v4 }
 0x3dc   : > { %v1079_v38 = vmax.f32 %v1063_v35, 0.0 }
 0x3dd   : > { %v1078_v42 = vmax.f32 %v1062_v59, 0.0  ;;  %v2338_v43 = vpop.f32.mrb[2].mxu0 }
 0x3de   : > { %v1065_v17 = vadd.f32 %v2338_v43, %v3800_v6  ;;  %v993_v18 = vpop.f32.mrb[3].mxu0 }
 0x3df   : > { %v2670_v62 = vpack.c.bf16 %v1079_v38, %v1078_v42  ;;  %v1064_v20 = vadd.f32 %v993_v18, %v3803_v9 }
 0x3e0   : > { %v1081_v22 = vmax.f32 %v1065_v17, 0.0 }
 0x3e1   : > { %v1080_v23 = vmax.f32 %v1064_v20, 0.0  ;;  %v2341_v25 = vpop.f32.mrb[4].mxu0  ;;  %2671 = vmatprep.subr.bf16.mxu1 %v2670_v62 }
 0x3e2   : > { %v1067_v1 = vadd.f32 %v2341_v25, %v3806_v11  ;;  %v1003_v41 = vpop.f32.mrb[5].mxu0  ;;  %2673 = vmatpush3.bf16.msra.mxu1 %v2670_v62 }
 0x3e3   : > { %v2674_v27 = vpack.c.bf16 %v1081_v22, %v1080_v23  ;;  %v1066_v45 = vadd.f32 %v1003_v41, %v3809_v14 }
 0x3e4   : > { %v1083_v28 = vmax.f32 %v1067_v1, 0.0 }
 0x3e5   : > { %v1082_v47 = vmax.f32 %v1066_v45, 0.0  ;;  %v2344_v30 = vpop.f32.mrb[6].mxu0  ;;  %2675 = vmatprep.subr.bf16.mxu1 %v2674_v27 }
 0x3e6   : > { %v1069_v50 = vadd.f32 %v2344_v30, %v3812_v16  ;;  %v1013_v32 = vpop.f32.mrb[7].mxu0  ;;  %2677 = vmatpush3.bf16.msra.mxu1 %v2674_v27 }
 0x3e7   : > { %v2678_v53 = vpack.c.bf16 %v1083_v28, %v1082_v47  ;;  %v1068_v33 = vadd.f32 %v1013_v32, %v3815_v19 }
 0x3e8   : > { %v1085_v56 = vmax.f32 %v1069_v50, 0.0 }
 0x3e9   : > { %v1084_v35 = vmax.f32 %v1068_v33, 0.0  ;;  %v2347_v37 = vpop.f32.mrb[8].mxu0  ;;  %2679 = vmatprep.subr.bf16.mxu1 %v2678_v53 }
 0x3ea   : > { %v1071_v59 = vadd.f32 %v2347_v37, %v3818_v21  ;;  %v1023_v38 = vpop.f32.mrb[9].mxu0  ;;  %2681 = vmatpush3.bf16.msra.mxu1 %v2678_v53 }
 0x3eb   : > { %v2682_v42 = vpack.c.bf16 %v1085_v56, %v1084_v35  ;;  %v1070_v43 = vadd.f32 %v1023_v38, %v3821_v24 }
 0x3ec   : > { %v1087_v17 = vmax.f32 %v1071_v59, 0.0 }
 0x3ed   : > { %v1086_v18 = vmax.f32 %v1070_v43, 0.0  ;;  %v2350_v62 = vpop.f32.mrb[10].mxu0  ;;  %2683 = vmatprep.subr.bf16.mxu1 %v2682_v42 }
 0x3ee   : > { %v1073_v20 = vadd.f32 %v2350_v62, %v3824_v26  ;;  %v1033_v22 = vpop.f32.mrb[11].mxu0  ;;  %2685 = vmatpush3.bf16.msra.mxu1 %v2682_v42 }
 0x3ef   : > { %v2686_v23 = vpack.c.bf16 %v1087_v17, %v1086_v18  ;;  %v1072_v25 = vadd.f32 %v1033_v22, %v3827_v29  ;;  %v1517_v17 = vld [vmem:[#allocation16 + $0x20] sm:$0xff]  ;;  %v1518_v18 = vld [vmem:[#allocation16 + $0x28] sm:$0xff]  ;;  %v1520_v22 = vld [vmem:[#allocation16 + $0x38] sm:$0xff] }
 0x3f0   : > { %v1089_v1 = vmax.f32 %v1073_v20, 0.0  ;;  %v2774_v62 = vpack.c.bf16 %v1518_v18, %v1517_v17  ;;  %v1519_v20 = vld [vmem:[#allocation16 + $0x30] sm:$0xff] }
 0x3f1   : > { %v1088_v41 = vmax.f32 %v1072_v25, 0.0  ;;  %v2353_v27 = vpop.f32.mrb[12].mxu0  ;;  %2687 = vmatprep.subr.bf16.mxu1 %v2686_v23  ;;  %v1521_v25 = vld [vmem:[#allocation16 + $0x40] sm:$0xff] }
 0x3f2   : > { %v1075_v45 = vadd.f32 %v2353_v27, %v3830_v31  ;;  %v1043_v28 = vpop.f32.mrb[13].mxu0  ;;  %2689 = vmatpush3.bf16.msra.mxu1 %v2686_v23  ;;  %v2778_v23 = vpack.c.bf16 %v1520_v22, %v1519_v20  ;;  %v1523_v27 = vld [vmem:[#allocation16 + $0x50] sm:$0xff] }
 0x3f3   : > { %v2690_v47 = vpack.c.bf16 %v1089_v1, %v1088_v41  ;;  %v1074_v30 = vadd.f32 %v1043_v28, %v3833_v34  ;;  %v1522_v1 = vld [vmem:[#allocation16 + $0x48] sm:$0xff] }
 0x3f4   : > { %v1091_v50 = vmax.f32 %v1075_v45, 0.0  ;;  %v2782_v41 = vpack.c.bf16 %v1522_v1, %v1521_v25  ;;  %v1524_v45 = vld [vmem:[#allocation16 + $0x58] sm:$0xff] }
 0x3f5   : > { %v1090_v32 = vmax.f32 %v1074_v30, 0.0  ;;  %v2356_v53 = vpop.f32.mrb[14].mxu0  ;;  %2691 = vmatprep.subr.bf16.mxu1 %v2690_v47  ;;  %v2786_v28 = vpack.c.bf16 %v1524_v45, %v1523_v27  ;;  %v1526_v30 = vld [vmem:[#allocation16 + $0x68] sm:$0xff] }
 0x3f6   : > { %v1077_v33 = vadd.f32 %v2356_v53, %v3836_v36  ;;  %v1053_v56 = vpop.f32.mrb[15].mxu0  ;;  %2693 = vmatpush3.bf16.msra.mxu1 %v2690_v47  ;;  %v1525_v47 = vld [vmem:[#allocation16 + $0x60] sm:$0xff]  ;;  %v1528_v53 = vld [vmem:[#allocation16 + $0x78] sm:$0xff] }
 0x3f7   : > { %v2694_v35 = vpack.c.bf16 %v1091_v50, %v1090_v32  ;;  %v1076_v37 = vadd.f32 %v1053_v56, %v3839_v39  ;;  %v2790_v50 = vpack.c.bf16 %v1526_v30, %v1525_v47  ;;  %v1527_v32 = vld [vmem:[#allocation16 + $0x70] sm:$0xff] }
 0x3f8   : > { %v1093_v59 = vmax.f32 %v1077_v33, 0.0  ;;  %v2794_v33 = vpack.c.bf16 %v1528_v53, %v1527_v32  ;;  %v1498_v32 = vld [vmem:[#allocation15 + $0x8] sm:$0xff] }
 0x3f9   : > { %v1092_v38 = vmax.f32 %v1076_v37, 0.0  ;;  %2695 = vmatprep.subr.bf16.mxu1 %v2694_v35 }
 0x3fa   : > { %2697 = vmatpush3.bf16.msra.mxu1 %v2694_v35 }
 0x3fb   : > { %v2698_v42 = vpack.c.bf16 %v1093_v59, %v1092_v38 }
 0x3fd   : > { %2699 = vmatprep.subr.bf16.mxu1 %v2698_v42 }
 0x3fe   : > { %2701 = vmatpush3.bf16.msra.mxu1 %v2698_v42 }
 0x401   : > { %2390 = vmatmul.mubr.f32.vlgmr.msra.gmra.mrb[32].mxu1 %v1935_v46 }
 0x402   : > { %2392 = vmatprep.mubr.f32.mxu1 %v1938_v48 }
 0x405   : > { %2393 = vmatmul.mubr.f32.gmra.mrb[34].mxu1 %v1939_v51 }
 0x406   : > { %2395 = vmatprep.mubr.f32.mxu1 %v1942_v52 }
 0x409   : > { %2396 = vmatmul.mubr.f32.gmra.mrb[36].mxu1 %v1943_v55 }
 0x40a   : > { %2398 = vmatprep.mubr.f32.mxu1 %v1946_v57 }
 0x40d   : > { %2399 = vmatmul.mubr.f32.gmra.mrb[38].mxu1 %v1947_v60 }
 0x40e   : > { %2401 = vmatprep.mubr.f32.mxu1 %v1950_v61 }
 0x411   : > { %2402 = vmatmul.mubr.f32.gmra.mrb[40].mxu1 %v1951_v0 }
 0x412   : > { %2404 = vmatprep.mubr.f32.mxu1 %v1954_v3 }
 0x415   : > { %2405 = vmatmul.mubr.f32.gmra.mrb[42].mxu1 %v1955_v7  ;;  %v1966_v7 = vunpack.c.l.bf16 %v3972_v5 }
 0x416   : > { %2407 = vmatprep.mubr.f32.mxu1 %v1958_v8  ;;  %v1513_v8 = vld [vmem:[#allocation16] sm:$0xff] }
 0x419   : > { %2408 = vmatmul.mubr.f32.gmra.mrb[44].mxu1 %v1959_v12  ;;  %v1515_v12 = vld [vmem:[#allocation16 + $0x10] sm:$0xff] }
 0x41a   : > { %2410 = vmatprep.mubr.f32.mxu1 %v1962_v13  ;;  %v2766_v13 = vpack.c.bf16 %v1514_v10, %v1513_v8 }
 0x41c   : > { %2767 = vmatprep.subr.bf16.mxu0 %v2766_v13 }
 0x41d   : > { %2411 = vmatmul.mubr.f32.gmra.mrb[46].mxu1 %v1963_v15  ;;  %v1516_v15 = vld [vmem:[#allocation16 + $0x18] sm:$0xff] }
 0x41e   : > { %2501 = vmatprep.mubr.f32.mxu1 %v1966_v7  ;;  %v2770_v43 = vpack.c.bf16 %v1516_v15, %v1515_v12 }
 0x4d4   : > { %v2391_v40 = vpop.f32.mrb[32].mxu1 }
 0x4d5   : > { %v1160_v44 = vpop.f32.mrb[33].mxu1 }
 0x4d6   : > { %2445 = vmatprep.mubr.f32.mxu0 %v1160_v44 }
 0x4d7   : > { %2446 = vmatmul.mubr.f32.vlgmr.msra.gmra.mrb[16].mxu0 %v2391_v40 }
 0x4d8   : > { %v2394_v46 = vpop.f32.mrb[34].mxu1  ;;  %2769 = vmatpush3.bf16.msra.mxu0 %v2766_v13 }
 0x4d9   : > { %v1170_v48 = vpop.f32.mrb[35].mxu1  ;;  %2771 = vmatprep.subr.bf16.mxu0 %v2770_v43 }
 0x4da   : > { %2448 = vmatprep.mubr.f32.mxu0 %v1170_v48 }
 0x4db   : > { %2449 = vmatmul.mubr.f32.gmra.mrb[18].mxu0 %v2394_v46 }
 0x4dc   : > { %v2397_v49 = vpop.f32.mrb[36].mxu1  ;;  %2773 = vmatpush3.bf16.msra.mxu0 %v2770_v43 }
 0x4dd   : > { %v1180_v51 = vpop.f32.mrb[37].mxu1  ;;  %2775 = vmatprep.subr.bf16.mxu0 %v2774_v62 }
 0x4de   : > { %2451 = vmatprep.mubr.f32.mxu0 %v1180_v51 }
 0x4df   : > { %2452 = vmatmul.mubr.f32.gmra.mrb[20].mxu0 %v2397_v49 }
 0x4e0   : > { %v2400_v52 = vpop.f32.mrb[38].mxu1  ;;  %2777 = vmatpush3.bf16.msra.mxu0 %v2774_v62 }
 0x4e1   : > { %v1190_v54 = vpop.f32.mrb[39].mxu1  ;;  %2779 = vmatprep.subr.bf16.mxu0 %v2778_v23 }
 0x4e2   : > { %2454 = vmatprep.mubr.f32.mxu0 %v1190_v54 }
 0x4e3   : > { %2455 = vmatmul.mubr.f32.gmra.mrb[22].mxu0 %v2400_v52 }
 0x4e4   : > { %v2403_v55 = vpop.f32.mrb[40].mxu1  ;;  %2781 = vmatpush3.bf16.msra.mxu0 %v2778_v23 }
 0x4e5   : > { %v1200_v57 = vpop.f32.mrb[41].mxu1  ;;  %2783 = vmatprep.subr.bf16.mxu0 %v2782_v41 }
 0x4e6   : > { %2457 = vmatprep.mubr.f32.mxu0 %v1200_v57 }
 0x4e7   : > { %2458 = vmatmul.mubr.f32.gmra.mrb[24].mxu0 %v2403_v55 }
 0x4e8   : > { %v2406_v58 = vpop.f32.mrb[42].mxu1  ;;  %2785 = vmatpush3.bf16.msra.mxu0 %v2782_v41 }
 0x4e9   : > { %v1210_v60 = vpop.f32.mrb[43].mxu1  ;;  %2787 = vmatprep.subr.bf16.mxu0 %v2786_v28 }
 0x4ea   : > { %2460 = vmatprep.mubr.f32.mxu0 %v1210_v60 }
 0x4eb   : > { %2461 = vmatmul.mubr.f32.gmra.mrb[26].mxu0 %v2406_v58 }
 0x4ec   : > { %v2409_v61 = vpop.f32.mrb[44].mxu1  ;;  %2789 = vmatpush3.bf16.msra.mxu0 %v2786_v28 }
 0x4ed   : > { %v1220_v63 = vpop.f32.mrb[45].mxu1  ;;  %2791 = vmatprep.subr.bf16.mxu0 %v2790_v50 }
 0x4ee   : > { %2463 = vmatprep.mubr.f32.mxu0 %v1220_v63 }
 0x4ef   : > { %2464 = vmatmul.mubr.f32.gmra.mrb[28].mxu0 %v2409_v61 }
 0x4f0   : > { %v2412_v0 = vpop.f32.mrb[46].mxu1  ;;  %2793 = vmatpush3.bf16.msra.mxu0 %v2790_v50  ;;  %v1497_v50 = vld [vmem:[#allocation15] sm:$0xff] }
 0x4f1   : > { %v1230_v3 = vpop.f32.mrb[47].mxu1  ;;  %2795 = vmatprep.subr.bf16.mxu0 %v2794_v33  ;;  %v2798_v53 = vpack.c.bf16 %v1498_v32, %v1497_v50 }
 0x4f2   : > { %2466 = vmatprep.mubr.f32.mxu0 %v1230_v3 }
 0x4f3   : > { %2467 = vmatmul.mubr.f32.gmra.mrb[30].mxu0 %v2412_v0 }
 0x4f4   : > { %2797 = vmatpush3.bf16.msra.mxu0 %v2794_v33  ;;  %v1500_v33 = vld [vmem:[#allocation15 + $0x18] sm:$0xff] }
 0x4f5   : > { %2799 = vmatprep.subr.bf16.mxu0 %v2798_v53 }
 0x5aa   : > { %v2447_v56 = vpop.f32.mrb[16].mxu0 }
 0x5ab   : > { %v1385_v35 = vadd.f32 %v2447_v56, %v3794_v2  ;;  %v1305_v37 = vpop.f32.mrb[17].mxu0 }
 0x5ac   : > { %v1384_v59 = vadd.f32 %v1305_v37, %v3797_v4  ;;  %v1495_v37 = vld [vmem:[%s3703_s12] sm:$0xff] }
 0x5ad   : > { %v1401_v38 = vmax.f32 %v1385_v35, 0.0 }
 0x5ae   : > { %v1400_v42 = vmax.f32 %v1384_v59, 0.0  ;;  %v2450_v40 = vpop.f32.mrb[18].mxu0  ;;  %v1501_v59 = vld [vmem:[#allocation15 + $0x20] sm:$0xff] }
 0x5af   : > { %v1387_v44 = vadd.f32 %v2450_v40, %v3800_v6  ;;  %v1315_v46 = vpop.f32.mrb[19].mxu0  ;;  %v1504_v40 = vld [vmem:[#allocation15 + $0x38] sm:$0xff] }
 0x5b0   : > { %v2734_v48 = vpack.c.bf16 %v1401_v38, %v1400_v42  ;;  %v1386_v49 = vadd.f32 %v1315_v46, %v3803_v9  ;;  %v1502_v38 = vld [vmem:[#allocation15 + $0x28] sm:$0xff]  ;;  %v1503_v42 = vld [vmem:[#allocation15 + $0x30] sm:$0xff]  ;;  %v1505_v46 = vld [vmem:[#allocation15 + $0x40] sm:$0xff] }
 0x5b1   : > { %v1403_v51 = vmax.f32 %v1387_v44, 0.0  ;;  %v2810_v44 = vpack.c.bf16 %v1504_v40, %v1503_v42 }
 0x5b2   : > { %v1402_v52 = vmax.f32 %v1386_v49, 0.0  ;;  %v2453_v54 = vpop.f32.mrb[20].mxu0  ;;  %2735 = vmatprep.subr.bf16.mxu1 %v2734_v48 }
 0x5b3   : > { %v1389_v55 = vadd.f32 %v2453_v54, %v3806_v11  ;;  %v1325_v57 = vpop.f32.mrb[21].mxu0  ;;  %2737 = vmatpush3.bf16.msra.mxu1 %v2734_v48  ;;  %v1506_v48 = vld [vmem:[#allocation15 + $0x48] sm:$0xff] }
 0x5b4   : > { %v2738_v2 = vpack.c.bf16 %v1403_v51, %v1402_v52  ;;  %v1388_v4 = vadd.f32 %v1325_v57, %v3809_v14  ;;  %v2814_v49 = vpack.c.bf16 %v1506_v48, %v1505_v46  ;;  %v1507_v51 = vld [vmem:[#allocation15 + $0x50] sm:$0xff]  ;;  %v1508_v52 = vld [vmem:[#allocation15 + $0x58] sm:$0xff]  ;;  %v1510_v57 = vld [vmem:[#allocation15 + $0x68] sm:$0xff] }
 0x5b5   : > { %v1405_v58 = vmax.f32 %v1389_v55, 0.0  ;;  %v2818_v54 = vpack.c.bf16 %v1508_v52, %v1507_v51  ;;  %v1509_v55 = vld [vmem:[#allocation15 + $0x60] sm:$0xff] }
 0x5b6   : > { %v1404_v60 = vmax.f32 %v1388_v4, 0.0  ;;  %v2456_v61 = vpop.f32.mrb[22].mxu0  ;;  %2739 = vmatprep.subr.bf16.mxu1 %v2738_v2  ;;  %v1511_v4 = vld [vmem:[#allocation15 + $0x70] sm:$0xff] }
 0x5b7   : > { %v1391_v6 = vadd.f32 %v2456_v61, %v3812_v16  ;;  %v1335_v63 = vpop.f32.mrb[23].mxu0  ;;  %2741 = vmatpush3.bf16.msra.mxu1 %v2738_v2  ;;  %v2822_v2 = vpack.c.bf16 %v1510_v57, %v1509_v55  ;;  %v1496_v61 = vld [vmem:[%s3703_s12 + $0x8] sm:$0xff]  ;;  %s3183_s12 = scalar_lea.vmem %s4001_s21, 256 }
 0x5b8   : > { %v2742_v9 = vpack.c.bf16 %v1405_v58, %v1404_v60  ;;  %v1390_v0 = vadd.f32 %v1335_v63, %v3815_v19  ;;  %v1512_v58 = vld [vmem:[#allocation15 + $0x78] sm:$0xff]  ;;  %p3184_p12 = scmp.ne.s32.totalorder %s4001_s21, %s3183_s12  ;;  %p3191_p8 = scmp.lt.s32.totalorder %s3189_s13, %s3183_s12 }
 0x5b9   : > { %v1407_v3 = vmax.f32 %v1391_v6, 0.0  ;;  %v2826_v60 = vpack.c.bf16 %v1512_v58, %v1511_v4  ;;  %v1691_v6 = vlaneseq }
 0x5ba   : > { %v1406_v7 = vmax.f32 %v1390_v0, 0.0  ;;  %v2459_v8 = vpop.f32.mrb[24].mxu0  ;;  %2743 = vmatprep.subr.bf16.mxu1 %v2742_v9  ;;  %p3185_p13 = pnand %p3184_p12, %p4127_p1  ;;  %p3192_p11 = por %p3191_p8, %p3190_p6 }
 0x5bb   : > { %v1393_v11 = vadd.f32 %v2459_v8, %v3818_v21  ;;  %v1345_v10 = vpop.f32.mrb[25].mxu0  ;;  %2745 = vmatpush3.bf16.msra.mxu1 %v2742_v9  ;;  %v1692_v63 = vshrl.u32 %v1691_v6, 7  ;;  %v1921_v9 = vld [vmem:[%s4124_s25] ss:$0 sm:$0xff] }
 0x5bc   : > { %v2746_v14 = vpack.c.bf16 %v1407_v3, %v1406_v7  ;;  %v1392_v12 = vadd.f32 %v1345_v10, %v3821_v24  ;;  %v1694_v3 = vstv %s1690_s28  ;;  %p3186_p4 = pneg %p3185_p13 }
 0x5bd   : > { %v1409_v13 = vmax.f32 %v1393_v11, 0.0  ;;  %v1693_v0 = vadd.s32 8, %v1692_v63  ;;  %vm1695_vm1 = vcmp.lt.s32.totalorder %v1692_v63, %v1694_v3 }
 0x5be   : > { %v1408_v15 = vmax.f32 %v1392_v12, 0.0  ;;  %v2462_v43 = vpop.f32.mrb[26].mxu0  ;;  %2747 = vmatprep.subr.bf16.mxu1 %v2746_v14  ;;  %p3193_p9 = pnand %p3192_p11, %p3186_p4 }
 0x5bf   : > { %v1395_v16 = vadd.f32 %v2462_v43, %v3824_v26  ;;  %v1355_v17 = vpop.f32.mrb[27].mxu0  ;;  %2749 = vmatpush3.bf16.msra.mxu1 %v2746_v14  ;;  %vm1696_vm0 = vcmp.lt.s32.totalorder %v1693_v0, %v1694_v3 }
 0x5c0   : > { %v2750_v19 = vpack.c.bf16 %v1409_v13, %v1408_v15  ;;  %v1394_v18 = vadd.f32 %v1355_v17, %v3827_v29 }
 0x5c1   : > { %v1411_v62 = vmax.f32 %v1395_v16, 0.0 }
 0x5c2   : > { %v1410_v20 = vmax.f32 %v1394_v18, 0.0  ;;  %v2465_v22 = vpop.f32.mrb[28].mxu0  ;;  %2751 = vmatprep.subr.bf16.mxu1 %v2750_v19 }
 0x5c3   : > { %v1397_v21 = vadd.f32 %v2465_v22, %v3830_v31  ;;  %v1365_v23 = vpop.f32.mrb[29].mxu0  ;;  %2753 = vmatpush3.bf16.msra.mxu1 %v2750_v19 }
 0x5c4   : > { %v2754_v24 = vpack.c.bf16 %v1411_v62, %v1410_v20  ;;  %v1396_v25 = vadd.f32 %v1365_v23, %v3833_v34  ;;  %v1967_v34 = vunpack.c.h.bf16 %v3972_v5  ;;  %v2806_v5 = vpack.c.bf16 %v1502_v38, %v1501_v59 }
 0x5c5   : > { %v1413_v1 = vmax.f32 %v1397_v21, 0.0 }
 0x5c6   : > { %v1412_v41 = vmax.f32 %v1396_v25, 0.0  ;;  %v2468_v27 = vpop.f32.mrb[30].mxu0  ;;  %2755 = vmatprep.subr.bf16.mxu1 %v2754_v24 }
 0x5c7   : > { %v1399_v26 = vadd.f32 %v2468_v27, %v3836_v36  ;;  %v1375_v45 = vpop.f32.mrb[31].mxu0  ;;  %2757 = vmatpush3.bf16.msra.mxu1 %v2754_v24  ;;  %v1499_v36 = vld [vmem:[#allocation15 + $0x10] sm:$0xff] }
 0x5c8   : > { %v2758_v29 = vpack.c.bf16 %v1413_v1, %v1412_v41  ;;  %v1398_v28 = vadd.f32 %v1375_v45, %v3839_v39  ;;  %v2802_v39 = vpack.c.bf16 %v1500_v33, %v1499_v36 }
 0x5c9   : > { %v1415_v47 = vmax.f32 %v1399_v26, 0.0 }
 0x5ca   : > { %v1414_v30 = vmax.f32 %v1398_v28, 0.0  ;;  %2759 = vmatprep.subr.bf16.mxu1 %v2758_v29 }
 0x5cb   : > { %2761 = vmatpush3.bf16.msra.mxu1 %v2758_v29 }
 0x5cc   : > { %v2762_v31 = vpack.c.bf16 %v1415_v47, %v1414_v30 }
 0x5ce   : > { %2763 = vmatprep.subr.bf16.mxu1 %v2762_v31 }
 0x5cf   : > { %2765 = vmatpush3.bf16.msra.mxu1 %v2762_v31 }
 0x5d2   : > { %2502 = vmatmul.mubr.f32.vlgmr.msra.gmra.mrb[48].mxu1 %v1967_v34 }
 0x6a5   : > { %v2503_v56 = vpop.f32.mrb[48].mxu1 }
 0x6a6   : > { %v1486_v35 = vpop.f32.mrb[49].mxu1 }
 0x6a7   : > { %2536 = vmatprep.mubr.f32.mxu0 %v1486_v35 }
 0x6a8   : > { %2537 = vmatmul.mubr.f32.vlgmr.msra.gmra.mrb[32].mxu0 %v2503_v56 }
 0x6a9   : > { %2801 = vmatpush3.bf16.msra.mxu0 %v2798_v53  ;;  %2571 = vmatprep.mubr.f32.mxu0 %v1495_v37 }
 0x6aa   : > { %2803 = vmatprep.subr.bf16.mxu0 %v2802_v39 }
 0x6ad   : > { %2805 = vmatpush3.bf16.msra.mxu0 %v2802_v39 }
 0x6ae   : > { %2807 = vmatprep.subr.bf16.mxu0 %v2806_v5 }
 0x6b1   : > { %2809 = vmatpush3.bf16.msra.mxu0 %v2806_v5 }
 0x6b2   : > { %2811 = vmatprep.subr.bf16.mxu0 %v2810_v44 }
 0x6b5   : > { %2813 = vmatpush3.bf16.msra.mxu0 %v2810_v44 }
 0x6b6   : > { %2815 = vmatprep.subr.bf16.mxu0 %v2814_v49 }
 0x6b9   : > { %2817 = vmatpush3.bf16.msra.mxu0 %v2814_v49 }
 0x6ba   : > { %2819 = vmatprep.subr.bf16.mxu0 %v2818_v54 }
 0x6bd   : > { %2821 = vmatpush3.bf16.msra.mxu0 %v2818_v54 }
 0x6be   : > { %2823 = vmatprep.subr.bf16.mxu0 %v2822_v2 }
 0x6c1   : > { %2825 = vmatpush3.bf16.msra.mxu0 %v2822_v2 }
 0x6c2   : > { %2827 = vmatprep.subr.bf16.mxu0 %v2826_v60 }
 0x6c5   : > { %2829 = vmatpush3.bf16.msra.mxu0 %v2826_v60 }
 0x6c8   : > { %2572 = vmatmul.mubr.f32.vlgmr.msra.gmra.mrb[32].mxu0 %v1496_v61 }
 0x79b   : > { %v2573_v7 = vpop.f32.mrb[32].mxu0 }
 0x79c   : > { %v1687_v8 = vadd.f32 %v2573_v7, %v1921_v9  ;;  %v1670_v11 = vpop.f32.mrb[33].mxu0 }
 0x79d   : > { %v1686_v10 = vadd.f32 %v1921_v9, %v1670_v11 }
 0x79e   : > { %v1689_v14 = vmax.f32 %v1687_v8, 0.0 }
 0x79f   : > { %v1688_v12 = vmax.f32 %v1686_v10, 0.0 }
 0x7a0   : > { %v1698_v13 = vsel %vm1696_vm0, %v1689_v14, 0.0 }
 0x7a1   : > { %1700 = vst [vmem:[%s530_s2 + $0x8] sm:$0xff] %v1698_v13  ;;  %v1697_v15 = vsel %vm1695_vm1, %v1688_v12, 0.0 }
 0x7a2   : > { %1699 = vst [vmem:[%s530_s2] sm:$0xff] %v1697_v15 }
 0x7a3   : > { %3196 = shalt.err (!%p3193_p9)
}
 0x7a4   : > { %s3197_s6 = scalar_lea.hbm %s4006_s19, 256  ;;  %s3201_s20 = scalar_lea.hbm %s4126_s14, 512 }
 0x7a5   : > { %p3198_p0 = scmp.ne.s32.totalorder %s4006_s19, %s3197_s6  ;;  %p3202_p3 = scmp.lt.u32.totalorder %s4006_s19, %s4126_s14 }
 0x7a6   : > { %p3203_p2 = scmp.lt.u32.totalorder %s3201_s20, %s3197_s6  ;;  %p3205_p12 = scmp.lt.u32.totalorder %s3197_s6, %s4006_s19 }
 0x7a7   : > { %p3199_p5 = pnand %p3198_p0, %p4127_p1 }
 0x7a8   : > { %p3204_p10 = por %p3203_p2, %p3202_p3 }
 0x7a9   : > { %p3200_p7 = pneg %p3199_p5 }
 0x7aa   : > { %p3206_p13 = por %p3205_p12, %p3204_p10 }
 0x7ac   : > { %p3207_p4 = pnand %p3206_p13, %p3200_p7 }
 0x7ae   : > { %3210 = shalt.err (!%p3207_p4)
}
 0x7af   : > { %s3287_s28 = smov 128   ;;  %s3288_s5 = smov 8  }
 0x7b0   : > { %2856 = dma.vmem_to_hbm [thread:$0]  (%p4127_p1), %s4001_s21, 256, %s4006_s19, %s1702_s26, %s3287_s28, %s3287_s28, %s3288_s5  }
 0x7b1 PF: > { %s4128_s27 = sld [smem:[#allocation27_spill]]  ;;  %s4129_s25 = sld [smem:[#allocation29_spill]] }
 0x7b2   : > { %p4131_p8 = scmp.ge.s32.totalorder %s3271_s0, 2 }
 0x7b7   : > { %s1730_s2 = sand.u32 1, %s4128_s27   ;;  %p4130_p6 = scmp.ne.s32.totalorder %s4129_s25, 0 }
 0x7b8   : > { %s1731_s10 = scalar_lea.sflag [#allocation6], %s1730_s2 }
 0x7b9   : > { %p2885_p11 = pnand %p4131_p8, %p4130_p6 }
 0x7bb   : > { %3254 = dma.done.wait (!%p2885_p11), %s1731_s10, 256  }
 0x7bc   : > { %3256 = vsyncadd (!%p2885_p11), %s1731_s10, 4294967040  ;;  %s4132_s0 = sld [smem:[#allocation30_spill]]  ;;  %s4133_s29 = sld [smem:[#allocation28_spill]] }
 0x7bd   : > { %s4134_s25 = sld [smem:[#allocation32_spill]]  ;;  %s4135_s23 = smov %s3263_s24 }
 0x7c2   : > { %p35_p9 = scmp.ge.s32.totalorder %s4132_s0, 4   ;;  %s4136_s24 = smov %s4133_s29 }
 0x7c4   :  { %37 = sbr.rel (!%p35_p9) target bundleno = 24 (0x18), region = 154 }
 0x7cb   :  { %1736 = vsyncpa [#allocation5], 1 }
 0x7cc   :  { %1738 = vsyncpa [#allocation5 + $0x1], 1 }
 0x7cd   :  { %1739 = vsyncpa [#allocation8], 1 }
 0x7ce   :  { %1741 = vsyncpa [#allocation8 + $0x1], 1 }
 0x7cf   :  { %1742 = vsyncpa [#allocation11], 1 }
 0x7d0   :  { %1744 = vsyncpa [#allocation11 + $0x1], 1 }
 0x7d1   :  { %1745 = vsyncpa [#allocation14], 1 }
 0x7d2   :  { %1746 = vsyncpa [#allocation17], 1 }
 0x7d3   :  { %1747 = vsyncpa [#allocation6], 1 }
 0x7d4   :  { %1749 = vsyncpa [#allocation6 + $0x1], 1 }

</bundles_post_ra>
